<compile_context>
chip_gen: v6e
topology: v6e:2x2x1
jax: 0.10.0
libtpu: 0.0.40
codegen_flags: <defaults>
</compile_context>

<pallas_src>
import functools

import numpy as np
import jax
import jax.numpy as jnp
from jax.experimental import pallas as pl
from jax.experimental.pallas import tpu as pltpu

LANE = 128


def _round_up(x, m):
    return ((x + m - 1) // m) * m


# 32 MiB scoped VMEM is safe on v5e/v6e (128 MiB physical) and v7x (64 MiB physical).
# Budget at real DQN scale for the fused MLP (single w_eff stream, tm=512):
#   f32 : x 2x6.4MB + w1 2x6.4MB + w2/out/bias ~1.3MB  ~= 27 MB  (fits)
#   bf16: ~14 MB (recommended path).
# On v6e/v5e this limit could be raised to 64 MiB, but it is not needed here.
_COMPILER_PARAMS_M = pltpu.CompilerParams(
    dimension_semantics=("parallel",),
    vmem_limit_bytes=32 * 1024 * 1024,
)


# ----------------------------------------------------------------------------
# Pallas kernels
# ----------------------------------------------------------------------------
def _matmul_bias_kernel(x_ref, w_ref, b_ref, o_ref, *, act):
    """out = relu?(x @ w + b).  x:(tm,K) w:(K,N) b:(1,N).  Operands are streamed in
    their storage dtype (f32 or bf16); accumulation is f32."""
    acc = jnp.dot(x_ref[...], w_ref[...], preferred_element_type=jnp.float32)
    acc = acc + b_ref[...]
    if act:
        acc = jnp.maximum(acc, 0.0)
    o_ref[...] = acc.astype(o_ref.dtype)


def _fused_noisy_mlp_kernel(x_ref, w1_ref, b1_ref, w2_ref, b2_ref, o_ref):
    """Fused NoisyLinear(K1->H)+ReLU+NoisyLinear(H->Npad).

    w1/w2 are the pre-folded effective weights (w + noise*sigma, built in XLA at
    sample time), so the kernel is two dots + bias/relu; the hidden activation never
    leaves VMEM/vregs."""
    h = jnp.dot(x_ref[...], w1_ref[...], preferred_element_type=jnp.float32)
    h = jnp.maximum(h + b1_ref[...], 0.0)
    h = h.astype(w2_ref.dtype)
    out = jnp.dot(h, w2_ref[...], preferred_element_type=jnp.float32) + b2_ref[...]
    o_ref[...] = out.astype(o_ref.dtype)


# ----------------------------------------------------------------------------
# Pallas wrappers
# ----------------------------------------------------------------------------
def _pad_rows_to8(x):
    """Pad the leading (row) dim up to a multiple of 8 so every M block is 8-aligned.
    Returns (padded_x, original_rows)."""
    m = x.shape[0]
    pm = _round_up(m, 8)
    if pm != m:
        x = jnp.pad(x, ((0, pm - m), (0, 0)))
    return x, m


def matmul_bias_pallas(x, w, b2, *, act, out_dtype, tm_cap=512):
    """x:(M,K), w:(K,N) pre-laid-out, b2:(1,N) f32 -> (M,N) out_dtype.
    Grid tiled over M (auto-pipelined, 'parallel' for v7x megacore)."""
    x, m0 = _pad_rows_to8(x)
    M, K = x.shape
    N = w.shape[1]
    tm = min(tm_cap, M)                     # both multiples of 8
    grid = (pl.cdiv(M, tm),)
    out = pl.pallas_call(
        functools.partial(_matmul_bias_kernel, act=act),
        out_shape=jax.ShapeDtypeStruct((M, N), out_dtype),
        grid=grid,
        in_specs=[pl.BlockSpec((tm, K), lambda i: (i, 0)),
                  pl.BlockSpec((K, N), lambda i: (0, 0)),
                  pl.BlockSpec((1, N), lambda i: (0, 0))],
        out_specs=pl.BlockSpec((tm, N), lambda i: (i, 0)),
        compiler_params=_COMPILER_PARAMS_M,
    )(x, w, b2)
    return out[:m0]


def fused_noisy_mlp_pallas(x, fc1_eff, fc2_eff, *, out_dtype=jnp.float32, tm_cap=512):
    """One pallas_call for NoisyLinear(conv_out,512)+ReLU+NoisyLinear(512,Npad).
    fc*_eff hold the pre-folded effective weights (in,out) and f32 biases (1,out).
    Npad is the lane-padded (>=128) action dim; caller slices back to n_actions."""
    x, m0 = _pad_rows_to8(x)
    M, K1 = x.shape
    H = fc1_eff["w"].shape[1]
    Np = fc2_eff["w"].shape[1]
    tm = min(tm_cap, M)
    grid = (pl.cdiv(M, tm),)
    out = pl.pallas_call(
        _fused_noisy_mlp_kernel,
        out_shape=jax.ShapeDtypeStruct((M, Np), out_dtype),
        grid=grid,
        in_specs=[pl.BlockSpec((tm, K1), lambda i: (i, 0)),
                  pl.BlockSpec((K1, H), lambda i: (0, 0)),
                  pl.BlockSpec((1, H), lambda i: (0, 0)),
                  pl.BlockSpec((H, Np), lambda i: (0, 0)),
                  pl.BlockSpec((1, Np), lambda i: (0, 0))],
        out_specs=pl.BlockSpec((tm, Np), lambda i: (i, 0)),
        compiler_params=_COMPILER_PARAMS_M,
    )(x, fc1_eff["w"], fc1_eff["b"], fc2_eff["w"], fc2_eff["b"])
    return out[:m0]


# ----------------------------------------------------------------------------
# Conv layer = im2col (fused XLA glue under jit) + Pallas matmul kernel
# ----------------------------------------------------------------------------
def _im2col(x_nhwc, k, s):
    """x:(N,H,W,C) -> patches (N*OH*OW, k*k*C), flat order ((kh*k+kw)*C + c)."""
    N, H, W, C = x_nhwc.shape
    OH = (H - k) // s + 1
    OW = (W - k) // s + 1
    cols = []
    for kh in range(k):
        for kw in range(k):
            cols.append(x_nhwc[:, kh:kh + s * OH:s, kw:kw + s * OW:s, :])
    patches = jnp.stack(cols, axis=3).reshape(N, OH, OW, k * k * C)
    return patches.reshape(N * OH * OW, k * k * C), (N, OH, OW)


def conv_layer_pallas(x_nhwc, w_mat, b2, *, k, s, relu, out_dtype):
    """Valid conv, stride s.  w_mat is the pre-laid-out (k*k*Cin, Cout) matrix in the
    compute dtype; the output is stored in the compute dtype too (halves writeback and
    the next layer's reads on the bf16 path)."""
    cout = w_mat.shape[1]
    patches, (N, OH, OW) = _im2col(x_nhwc, k, s)
    out = matmul_bias_pallas(patches, w_mat, b2, act=relu, out_dtype=out_dtype)
    return out.reshape(N, OH, OW, cout)


# ----------------------------------------------------------------------------
# Parameters (torch layout), one-time kernel-layout preparation, noise sampling
# ----------------------------------------------------------------------------
def init_params(key, input_shape, n_actions, sigma_init=0.017):
    C, H, W = input_shape
    keys = jax.random.split(key, 10)

    def conv_init(kw_key, kb_key, cout, cin, k):
        bound = 1.0 / np.sqrt(cin * k * k)
        w = jax.random.uniform(kw_key, (cout, cin, k, k), jnp.float32, -bound, bound)
        b = jax.random.uniform(kb_key, (cout,), jnp.float32, -bound, bound)
        return {"w": w, "b": b}

    def noisy_init(kw_key, kb_key, in_f, out_f):
        std = np.sqrt(3.0 / in_f)  # NoisyLinear.reset_parameters
        return {
            "w": jax.random.uniform(kw_key, (out_f, in_f), jnp.float32, -std, std),
            "b": jax.random.uniform(kb_key, (out_f,), jnp.float32, -std, std),
            "sw": jnp.full((out_f, in_f), sigma_init, jnp.float32),
            "sb": jnp.full((out_f,), sigma_init, jnp.float32),
        }

    oh1, ow1 = (H - 8) // 4 + 1, (W - 8) // 4 + 1
    oh2, ow2 = (oh1 - 4) // 2 + 1, (ow1 - 4) // 2 + 1
    oh3, ow3 = oh2 - 3 + 1, ow2 - 3 + 1
    conv_out = 64 * oh3 * ow3
    dims = {"C": C, "oh3": oh3, "ow3": ow3, "conv_out": conv_out}

    params = {
        "conv1": conv_init(keys[0], keys[1], 32, C, 8),
        "conv2": conv_init(keys[2], keys[3], 64, 32, 4),
        "conv3": conv_init(keys[4], keys[5], 64, 64, 3),
        "fc1": noisy_init(keys[6], keys[7], conv_out, 512),
        "fc2": noisy_init(keys[8], keys[9], 512, n_actions),
    }
    return params, dims


def prepare_params(params, dims, n_actions):
    """One-time conversion torch layout -> kernel layout (runs at init, never per
    forward): conv weights as (k*k*Cin,Cout), fc weights as (in,out), the NCHW-flatten
    permutation folded into fc1, fc2 lane-padded to a multiple of 128.  Everything
    stays f32 here (master copies); the per-forward effective/compute-dtype weights
    are built in _effective_params."""
    oh3, ow3 = dims["oh3"], dims["ow3"]
    conv_out = dims["conv_out"]
    cc = params["conv3"]["w"].shape[0]          # conv3 Cout (=64)
    hdim = params["fc1"]["w"].shape[0]          # hidden (=512)

    def conv_prep(p, k, cin, cout):
        # (Cout,Cin,KH,KW) -> (KH,KW,Cin,Cout) -> (KH*KW*Cin, Cout): matches im2col order.
        w = jnp.transpose(p["w"], (2, 3, 1, 0)).reshape(k * k * cin, cout)
        return {"w": w, "b": p["b"].reshape(1, cout)}

    def fold_fc1(a):   # (512, conv_out) with in=(c,oh,ow)  ->  (conv_out=(oh,ow,c), 512)
        a = a.reshape(hdim, cc, oh3, ow3)
        return jnp.transpose(a, (2, 3, 1, 0)).reshape(conv_out, hdim)

    n_pad = _round_up(max(n_actions, LANE), LANE)

    def pad_fc2(a):    # (n_actions, 512) -> (512, n_pad)   (zero padding)
        return jnp.pad(a.T, ((0, 0), (0, n_pad - n_actions)))

    return {
        "conv1": conv_prep(params["conv1"], 8, dims["C"], 32),
        "conv2": conv_prep(params["conv2"], 4, 32, 64),
        "conv3": conv_prep(params["conv3"], 3, 64, 64),
        "fc1": {"w": fold_fc1(params["fc1"]["w"]),
                "b": params["fc1"]["b"].reshape(1, hdim),
                "sw": fold_fc1(params["fc1"]["sw"]),
                "sb": params["fc1"]["sb"].reshape(1, hdim)},
        "fc2": {"w": pad_fc2(params["fc2"]["w"]),
                "b": jnp.pad(params["fc2"]["b"], (0, n_pad - n_actions)).reshape(1, n_pad),
                "sw": pad_fc2(params["fc2"]["sw"]),
                "sb": jnp.pad(params["fc2"]["sb"], (0, n_pad - n_actions)).reshape(1, n_pad)},
    }


def sample_noise(key, prepped):
    """Fresh N(0,1) noise each forward (weight_noise.normal_() / bias_noise.normal_()),
    sampled directly in the kernel's (in,out) layout.  Scaling by sigma and adding the
    base weight happen in _effective_params (XLA, fused under jit)."""
    k1, k2, k3, k4 = jax.random.split(key, 4)
    f1, f2 = prepped["fc1"], prepped["fc2"]
    return {
        "fc1": {"w": jax.random.normal(k1, f1["w"].shape, jnp.float32),
                "b": jax.random.normal(k2, f1["b"].shape, jnp.float32)},
        "fc2": {"w": jax.random.normal(k3, f2["w"].shape, jnp.float32),
                "b": jax.random.normal(k4, f2["b"].shape, jnp.float32)},
    }


def _effective_params(prepped, noise, compute_dtype):
    """Fold w_eff = w + noise*sigma in XLA (fuses with the sampling math) and cast the
    streamed weights to the compute dtype, so every Pallas kernel streams a single
    weight array per layer with no in-kernel adds or casts.  Noisy-weight construction
    stays f32; biases stay f32 (added to the f32 accumulator)."""
    def conv_eff(p):
        return {"w": p["w"].astype(compute_dtype), "b": p["b"]}

    def fc_eff(p, n):
        return {"w": (p["w"] + n["w"] * p["sw"]).astype(compute_dtype),
                "b": p["b"] + n["b"] * p["sb"]}

    return {"conv1": conv_eff(prepped["conv1"]),
            "conv2": conv_eff(prepped["conv2"]),
            "conv3": conv_eff(prepped["conv3"]),
            "fc1": fc_eff(prepped["fc1"], noise["fc1"]),
            "fc2": fc_eff(prepped["fc2"], noise["fc2"])}


# ----------------------------------------------------------------------------
# NoisyDQN forward (Pallas path)
# ----------------------------------------------------------------------------
@functools.partial(jax.jit, static_argnames=("n_actions", "compute_dtype"))
def noisy_dqn_forward(x_nchw, prepped, noise, n_actions, compute_dtype=jnp.bfloat16):
    eff = _effective_params(prepped, noise, compute_dtype)
    # Public input is NCHW (PyTorch); internal conv path is NHWC in the compute dtype.
    x = jnp.transpose(x_nchw, (0, 2, 3, 1)).astype(compute_dtype)
    x = conv_layer_pallas(x, eff["conv1"]["w"], eff["conv1"]["b"],
                          k=8, s=4, relu=True, out_dtype=compute_dtype)
    x = conv_layer_pallas(x, eff["conv2"]["w"], eff["conv2"]["b"],
                          k=4, s=2, relu=True, out_dtype=compute_dtype)
    x = conv_layer_pallas(x, eff["conv3"]["w"], eff["conv3"]["b"],
                          k=3, s=1, relu=False, out_dtype=compute_dtype)
    # NHWC flatten is a pure reshape: the NCHW-flatten (torch .view) permutation was
    # folded into fc1's stored weight at prepare time.
    flat = x.reshape(x.shape[0], -1)
    out = fused_noisy_mlp_pallas(flat, eff["fc1"], eff["fc2"], out_dtype=jnp.float32)
    return out[:, :n_actions]


# ----------------------------------------------------------------------------
# Pure-JAX reference (torch-layout math; verifies the layout folding end-to-end)
# ----------------------------------------------------------------------------
def reference_forward(x_nchw, params, raw_noise, dims, n_actions):
    oh3, ow3 = dims["oh3"], dims["ow3"]
    conv_out = dims["conv_out"]
    cc = params["conv3"]["w"].shape[0]
    hdim = params["fc1"]["w"].shape[0]

    def conv(x, p, s):
        y = jax.lax.conv_general_dilated(
            x, p["w"], (s, s), "VALID",
            dimension_numbers=("NCHW", "OIHW", "NCHW"),
            precision=jax.lax.Precision.HIGHEST)
        return y + p["b"][None, :, None, None]

    x = x_nchw.astype(jnp.float32)
    x = jax.nn.relu(conv(x, params["conv1"], 4))
    x = jax.nn.relu(conv(x, params["conv2"], 2))
    x = conv(x, params["conv3"], 1)
    flat = x.reshape(x.shape[0], -1)            # NCHW flatten, like torch .view

    # Recover torch-layout noise from the kernel-layout samples.
    nw1 = raw_noise["fc1"]["w"].reshape(oh3, ow3, cc, hdim)
    nw1 = jnp.transpose(nw1, (3, 2, 0, 1)).reshape(hdim, conv_out)
    nb1 = raw_noise["fc1"]["b"].reshape(hdim)
    nw2 = raw_noise["fc2"]["w"][:, :n_actions].T
    nb2 = raw_noise["fc2"]["b"][0, :n_actions]

    def noisy(x_, layer, nw, nb):
        w = layer["w"] + nw * layer["sw"]
        b = layer["b"] + nb * layer["sb"]
        return jnp.dot(x_, w.T, precision=jax.lax.Precision.HIGHEST) + b

    h = jax.nn.relu(noisy(flat, params["fc1"], nw1, nb1))
    return noisy(h, params["fc2"], nw2, nb2)


# ----------------------------------------------------------------------------
if __name__ == "__main__":
    key = jax.random.PRNGKey(0)
    k_param, k_x, k_noise = jax.random.split(key, 3)

    # Small shapes consistent with the module (min spatial for this conv stack is 36).
    input_shape = (4, 36, 36)   # (C, H, W)
    n_actions = 6
    batch = 2

    params, dims = init_params(k_param, input_shape, n_actions)
    prepped = prepare_params(params, dims, n_actions)          # one-time layout prep
    x = jax.random.normal(k_x, (batch,) + input_shape, jnp.float32)   # NCHW
    noise = sample_noise(k_noise, prepped)                     # fresh N(0,1) per forward

    ref = reference_forward(x, params, noise, dims, n_actions)

    # f32 streaming path (tight check of the layout folding / kernels).
    out_f32 = noisy_dqn_forward(x, prepped, noise, n_actions=n_actions,
                                compute_dtype=jnp.float32)
    out_f32 = jax.block_until_ready(out_f32)
    assert out_f32.shape == (batch, n_actions)
    np.testing.assert_allclose(np.asarray(out_f32), np.asarray(ref), rtol=1e-3, atol=1e-3)

    # bf16 streaming path (recommended on v5e/v6e/v7x): weights and activations are
    # streamed from HBM as bf16, dots accumulate in f32, noisy-weight construction
    # stays f32 in XLA.  Checked with a correspondingly looser tolerance.
    out_bf16 = noisy_dqn_forward(x, prepped, noise, n_actions=n_actions,
                                 compute_dtype=jnp.bfloat16)
    out_bf16 = jax.block_until_ready(out_bf16)
    np.testing.assert_allclose(np.asarray(out_bf16), np.asarray(ref), rtol=5e-2, atol=5e-2)

    print("KERNEL_OK")
</pallas_src>

<mosaic_0001>
module attributes {stable_mosaic.version = 11 : i64} {
  func.func @_matmul_bias_kernel(%arg0: i32, %arg1: memref<128x256xf32, #tpu.memory_space<vmem>>, %arg2: memref<256x32xf32, #tpu.memory_space<vmem>>, %arg3: memref<1x32xf32, #tpu.memory_space<vmem>>, %arg4: memref<128x32xf32, #tpu.memory_space<vmem>>) attributes {dimension_semantics = [#tpu.dimension_semantics<parallel>], iteration_bounds = array<i64: 1>, scalar_prefetch = 0 : i64, scratch_operands = 0 : i64, tpu.core_type = #tpu.core_type<tc>, window_params = [{transform_indices = @transform_0, window_bounds = array<i64: 128, 256>}, {pipeline_mode = #tpu.pipeline_mode<synchronous>, transform_indices = @transform_1, window_bounds = array<i64: 256, 32>}, {pipeline_mode = #tpu.pipeline_mode<synchronous>, transform_indices = @transform_2, window_bounds = array<i64: 1, 32>}, {transform_indices = @transform_3, window_bounds = array<i64: 128, 32>}]} {
    %c0 = arith.constant 0 : index
    %c0_0 = arith.constant 0 : index
    %0 = vector.load %arg1[%c0, %c0_0] : memref<128x256xf32, #tpu.memory_space<vmem>>, vector<128x256xf32>
    %c0_1 = arith.constant 0 : index
    %c0_2 = arith.constant 0 : index
    %1 = vector.load %arg2[%c0_1, %c0_2] : memref<256x32xf32, #tpu.memory_space<vmem>>, vector<256x32xf32>
    %cst = arith.constant dense<0.000000e+00> : vector<128x32xf32>
    %2 = tpu.matmul %0, %1, %cst {dimension_numbers = #tpu.dot_dimension_numbers<[1], [0], [0], [1], [0, 0, 1, 1], [], []>} : vector<128x256xf32>, vector<256x32xf32>, vector<128x32xf32> -> vector<128x32xf32>
    %c0_3 = arith.constant 0 : index
    %c0_4 = arith.constant 0 : index
    %3 = vector.load %arg3[%c0_3, %c0_4] : memref<1x32xf32, #tpu.memory_space<vmem>>, vector<1x32xf32>
    %4 = vector.broadcast %3 : vector<1x32xf32> to vector<128x32xf32>
    %5 = arith.addf %2, %4 : vector<128x32xf32>
    %cst_5 = arith.constant 0.000000e+00 : f32
    %6 = vector.broadcast %cst_5 : f32 to vector<128x32xf32>
    %7 = arith.maximumf %5, %6 : vector<128x32xf32>
    %c0_6 = arith.constant 0 : index
    %c0_7 = arith.constant 0 : index
    %8 = vector.load %arg4[%c0_6, %c0_7] : memref<128x32xf32, #tpu.memory_space<vmem>>, vector<128x32xf32>
    tpu.vector_store %arg4[%c0_6, %c0_7], %7 {strides = array<i32>} : memref<128x32xf32, #tpu.memory_space<vmem>>, vector<128x32xf32>,
    return
  }
  func.func @transform_0(%arg0: i32) -> (i32, i32) {
    %c0_i32 = arith.constant 0 : i32
    %c0_i32_0 = arith.constant 0 : i32
    return %arg0, %c0_i32 : i32, i32
  }
  func.func @transform_1(%arg0: i32) -> (i32, i32) {
    %c0_i32 = arith.constant 0 : i32
    %c0_i32_0 = arith.constant 0 : i32
    %c0_i32_1 = arith.constant 0 : i32
    return %c0_i32, %c0_i32_0 : i32, i32
  }
  func.func @transform_2(%arg0: i32) -> (i32, i32) {
    %c0_i32 = arith.constant 0 : i32
    %c0_i32_0 = arith.constant 0 : i32
    %c0_i32_1 = arith.constant 0 : i32
    return %c0_i32, %c0_i32_0 : i32, i32
  }
  func.func @transform_3(%arg0: i32) -> (i32, i32) {
    %c0_i32 = arith.constant 0 : i32
    %c0_i32_0 = arith.constant 0 : i32
    return %arg0, %c0_i32 : i32, i32
  }
}

module attributes {stable_mosaic.version = 11 : i64} {
  func.func @_matmul_bias_kernel(%arg0: i32, %arg1: memref<24x512xf32, #tpu.memory_space<vmem>>, %arg2: memref<512x64xf32, #tpu.memory_space<vmem>>, %arg3: memref<1x64xf32, #tpu.memory_space<vmem>>, %arg4: memref<24x64xf32, #tpu.memory_space<vmem>>) attributes {dimension_semantics = [#tpu.dimension_semantics<parallel>], iteration_bounds = array<i64: 1>, scalar_prefetch = 0 : i64, scratch_operands = 0 : i64, tpu.core_type = #tpu.core_type<tc>, window_params = [{transform_indices = @transform_0, window_bounds = array<i64: 24, 512>}, {pipeline_mode = #tpu.pipeline_mode<synchronous>, transform_indices = @transform_1, window_bounds = array<i64: 512, 64>}, {pipeline_mode = #tpu.pipeline_mode<synchronous>, transform_indices = @transform_2, window_bounds = array<i64: 1, 64>}, {transform_indices = @transform_3, window_bounds = array<i64: 24, 64>}]} {
    %c0 = arith.constant 0 : index
    %c0_0 = arith.constant 0 : index
    %0 = vector.load %arg1[%c0, %c0_0] : memref<24x512xf32, #tpu.memory_space<vmem>>, vector<24x512xf32>
    %c0_1 = arith.constant 0 : index
    %c0_2 = arith.constant 0 : index
    %1 = vector.load %arg2[%c0_1, %c0_2] : memref<512x64xf32, #tpu.memory_space<vmem>>, vector<512x64xf32>
    %cst = arith.constant dense<0.000000e+00> : vector<24x64xf32>
    %2 = tpu.matmul %0, %1, %cst {dimension_numbers = #tpu.dot_dimension_numbers<[1], [0], [0], [1], [0, 0, 1, 1], [], []>} : vector<24x512xf32>, vector<512x64xf32>, vector<24x64xf32> -> vector<24x64xf32>
    %c0_3 = arith.constant 0 : index
    %c0_4 = arith.constant 0 : index
    %3 = vector.load %arg3[%c0_3, %c0_4] : memref<1x64xf32, #tpu.memory_space<vmem>>, vector<1x64xf32>
    %4 = vector.broadcast %3 : vector<1x64xf32> to vector<24x64xf32>
    %5 = arith.addf %2, %4 : vector<24x64xf32>
    %cst_5 = arith.constant 0.000000e+00 : f32
    %6 = vector.broadcast %cst_5 : f32 to vector<24x64xf32>
    %7 = arith.maximumf %5, %6 : vector<24x64xf32>
    %c0_6 = arith.constant 0 : index
    %c0_7 = arith.constant 0 : index
    %8 = vector.load %arg4[%c0_6, %c0_7] : memref<24x64xf32, #tpu.memory_space<vmem>>, vector<24x64xf32>
    tpu.vector_store %arg4[%c0_6, %c0_7], %7 {strides = array<i32>} : memref<24x64xf32, #tpu.memory_space<vmem>>, vector<24x64xf32>,
    return
  }
  func.func @transform_0(%arg0: i32) -> (i32, i32) {
    %c0_i32 = arith.constant 0 : i32
    %c0_i32_0 = arith.constant 0 : i32
    return %arg0, %c0_i32 : i32, i32
  }
  func.func @transform_1(%arg0: i32) -> (i32, i32) {
    %c0_i32 = arith.constant 0 : i32
    %c0_i32_0 = arith.constant 0 : i32
    %c0_i32_1 = arith.constant 0 : i32
    return %c0_i32, %c0_i32_0 : i32, i32
  }
  func.func @transform_2(%arg0: i32) -> (i32, i32) {
    %c0_i32 = arith.constant 0 : i32
    %c0_i32_0 = arith.constant 0 : i32
    %c0_i32_1 = arith.constant 0 : i32
    return %c0_i32, %c0_i32_0 : i32, i32
  }
  func.func @transform_3(%arg0: i32) -> (i32, i32) {
    %c0_i32 = arith.constant 0 : i32
    %c0_i32_0 = arith.constant 0 : i32
    return %arg0, %c0_i32 : i32, i32
  }
}

module attributes {stable_mosaic.version = 11 : i64} {
  func.func @_matmul_bias_kernel(%arg0: i32, %arg1: memref<8x576xf32, #tpu.memory_space<vmem>>, %arg2: memref<576x64xf32, #tpu.memory_space<vmem>>, %arg3: memref<1x64xf32, #tpu.memory_space<vmem>>, %arg4: memref<8x64xf32, #tpu.memory_space<vmem>>) attributes {dimension_semantics = [#tpu.dimension_semantics<parallel>], iteration_bounds = array<i64: 1>, scalar_prefetch = 0 : i64, scratch_operands = 0 : i64, tpu.core_type = #tpu.core_type<tc>, window_params = [{transform_indices = @transform_0, window_bounds = array<i64: 8, 576>}, {pipeline_mode = #tpu.pipeline_mode<synchronous>, transform_indices = @transform_1, window_bounds = array<i64: 576, 64>}, {pipeline_mode = #tpu.pipeline_mode<synchronous>, transform_indices = @transform_2, window_bounds = array<i64: 1, 64>}, {transform_indices = @transform_3, window_bounds = array<i64: 8, 64>}]} {
    %c0 = arith.constant 0 : index
    %c0_0 = arith.constant 0 : index
    %0 = vector.load %arg1[%c0, %c0_0] : memref<8x576xf32, #tpu.memory_space<vmem>>, vector<8x576xf32>
    %c0_1 = arith.constant 0 : index
    %c0_2 = arith.constant 0 : index
    %1 = vector.load %arg2[%c0_1, %c0_2] : memref<576x64xf32, #tpu.memory_space<vmem>>, vector<576x64xf32>
    %cst = arith.constant dense<0.000000e+00> : vector<8x64xf32>
    %2 = tpu.matmul %0, %1, %cst {dimension_numbers = #tpu.dot_dimension_numbers<[1], [0], [0], [1], [0, 0, 1, 1], [], []>} : vector<8x576xf32>, vector<576x64xf32>, vector<8x64xf32> -> vector<8x64xf32>
    %c0_3 = arith.constant 0 : index
    %c0_4 = arith.constant 0 : index
    %3 = vector.load %arg3[%c0_3, %c0_4] : memref<1x64xf32, #tpu.memory_space<vmem>>, vector<1x64xf32>
    %4 = vector.broadcast %3 : vector<1x64xf32> to vector<8x64xf32>
    %5 = arith.addf %2, %4 : vector<8x64xf32>
    %c0_5 = arith.constant 0 : index
    %c0_6 = arith.constant 0 : index
    %6 = vector.load %arg4[%c0_5, %c0_6] : memref<8x64xf32, #tpu.memory_space<vmem>>, vector<8x64xf32>
    tpu.vector_store %arg4[%c0_5, %c0_6], %5 {strides = array<i32>} : memref<8x64xf32, #tpu.memory_space<vmem>>, vector<8x64xf32>,
    return
  }
  func.func @transform_0(%arg0: i32) -> (i32, i32) {
    %c0_i32 = arith.constant 0 : i32
    %c0_i32_0 = arith.constant 0 : i32
    return %arg0, %c0_i32 : i32, i32
  }
  func.func @transform_1(%arg0: i32) -> (i32, i32) {
    %c0_i32 = arith.constant 0 : i32
    %c0_i32_0 = arith.constant 0 : i32
    %c0_i32_1 = arith.constant 0 : i32
    return %c0_i32, %c0_i32_0 : i32, i32
  }
  func.func @transform_2(%arg0: i32) -> (i32, i32) {
    %c0_i32 = arith.constant 0 : i32
    %c0_i32_0 = arith.constant 0 : i32
    %c0_i32_1 = arith.constant 0 : i32
    return %c0_i32, %c0_i32_0 : i32, i32
  }
  func.func @transform_3(%arg0: i32) -> (i32, i32) {
    %c0_i32 = arith.constant 0 : i32
    %c0_i32_0 = arith.constant 0 : i32
    return %arg0, %c0_i32 : i32, i32
  }
}

module attributes {stable_mosaic.version = 11 : i64} {
  func.func @_fused_noisy_mlp_kernel(%arg0: i32, %arg1: memref<8x64xf32, #tpu.memory_space<vmem>>, %arg2: memref<64x512xf32, #tpu.memory_space<vmem>>, %arg3: memref<1x512xf32, #tpu.memory_space<vmem>>, %arg4: memref<512x128xf32, #tpu.memory_space<vmem>>, %arg5: memref<1x128xf32, #tpu.memory_space<vmem>>, %arg6: memref<8x128xf32, #tpu.memory_space<vmem>>) attributes {dimension_semantics = [#tpu.dimension_semantics<parallel>], iteration_bounds = array<i64: 1>, scalar_prefetch = 0 : i64, scratch_operands = 0 : i64, tpu.core_type = #tpu.core_type<tc>, window_params = [{transform_indices = @transform_0, window_bounds = array<i64: 8, 64>}, {pipeline_mode = #tpu.pipeline_mode<synchronous>, transform_indices = @transform_1, window_bounds = array<i64: 64, 512>}, {pipeline_mode = #tpu.pipeline_mode<synchronous>, transform_indices = @transform_2, window_bounds = array<i64: 1, 512>}, {pipeline_mode = #tpu.pipeline_mode<synchronous>, transform_indices = @transform_3, window_bounds = array<i64: 512, 128>}, {pipeline_mode = #tpu.pipeline_mode<synchronous>, transform_indices = @transform_4, window_bounds = array<i64: 1, 128>}, {transform_indices = @transform_5, window_bounds = array<i64: 8, 128>}]} {
    %c0 = arith.constant 0 : index
    %c0_0 = arith.constant 0 : index
    %0 = vector.load %arg1[%c0, %c0_0] : memref<8x64xf32, #tpu.memory_space<vmem>>, vector<8x64xf32>
    %c0_1 = arith.constant 0 : index
    %c0_2 = arith.constant 0 : index
    %1 = vector.load %arg2[%c0_1, %c0_2] : memref<64x512xf32, #tpu.memory_space<vmem>>, vector<64x512xf32>
    %cst = arith.constant dense<0.000000e+00> : vector<8x512xf32>
    %2 = tpu.matmul %0, %1, %cst {dimension_numbers = #tpu.dot_dimension_numbers<[1], [0], [0], [1], [0, 0, 1, 1], [], []>} : vector<8x64xf32>, vector<64x512xf32>, vector<8x512xf32> -> vector<8x512xf32>
    %c0_3 = arith.constant 0 : index
    %c0_4 = arith.constant 0 : index
    %3 = vector.load %arg3[%c0_3, %c0_4] : memref<1x512xf32, #tpu.memory_space<vmem>>, vector<1x512xf32>
    %4 = vector.broadcast %3 : vector<1x512xf32> to vector<8x512xf32>
    %5 = arith.addf %2, %4 : vector<8x512xf32>
    %cst_5 = arith.constant 0.000000e+00 : f32
    %6 = vector.broadcast %cst_5 : f32 to vector<8x512xf32>
    %7 = arith.maximumf %5, %6 : vector<8x512xf32>
    %c0_6 = arith.constant 0 : index
    %c0_7 = arith.constant 0 : index
    %8 = vector.load %arg4[%c0_6, %c0_7] : memref<512x128xf32, #tpu.memory_space<vmem>>, vector<512x128xf32>
    %cst_8 = arith.constant dense<0.000000e+00> : vector<8x128xf32>
    %9 = tpu.matmul %7, %8, %cst_8 {dimension_numbers = #tpu.dot_dimension_numbers<[1], [0], [0], [1], [0, 0, 1, 1], [], []>} : vector<8x512xf32>, vector<512x128xf32>, vector<8x128xf32> -> vector<8x128xf32>
    %c0_9 = arith.constant 0 : index
    %c0_10 = arith.constant 0 : index
    %10 = vector.load %arg5[%c0_9, %c0_10] : memref<1x128xf32, #tpu.memory_space<vmem>>, vector<1x128xf32>
    %11 = vector.broadcast %10 : vector<1x128xf32> to vector<8x128xf32>
    %12 = arith.addf %9, %11 : vector<8x128xf32>
    %c0_11 = arith.constant 0 : index
    %c0_12 = arith.constant 0 : index
    %13 = vector.load %arg6[%c0_11, %c0_12] : memref<8x128xf32, #tpu.memory_space<vmem>>, vector<8x128xf32>
    tpu.vector_store %arg6[%c0_11, %c0_12], %12 {strides = array<i32>} : memref<8x128xf32, #tpu.memory_space<vmem>>, vector<8x128xf32>,
    return
  }
  func.func @transform_0(%arg0: i32) -> (i32, i32) {
    %c0_i32 = arith.constant 0 : i32
    %c0_i32_0 = arith.constant 0 : i32
    return %arg0, %c0_i32 : i32, i32
  }
  func.func @transform_1(%arg0: i32) -> (i32, i32) {
    %c0_i32 = arith.constant 0 : i32
    %c0_i32_0 = arith.constant 0 : i32
    %c0_i32_1 = arith.constant 0 : i32
    return %c0_i32, %c0_i32_0 : i32, i32
  }
  func.func @transform_2(%arg0: i32) -> (i32, i32) {
    %c0_i32 = arith.constant 0 : i32
    %c0_i32_0 = arith.constant 0 : i32
    %c0_i32_1 = arith.constant 0 : i32
    return %c0_i32, %c0_i32_0 : i32, i32
  }
  func.func @transform_3(%arg0: i32) -> (i32, i32) {
    %c0_i32 = arith.constant 0 : i32
    %c0_i32_0 = arith.constant 0 : i32
    %c0_i32_1 = arith.constant 0 : i32
    return %c0_i32, %c0_i32_0 : i32, i32
  }
  func.func @transform_4(%arg0: i32) -> (i32, i32) {
    %c0_i32 = arith.constant 0 : i32
    %c0_i32_0 = arith.constant 0 : i32
    %c0_i32_1 = arith.constant 0 : i32
    return %c0_i32, %c0_i32_0 : i32, i32
  }
  func.func @transform_5(%arg0: i32) -> (i32, i32) {
    %c0_i32 = arith.constant 0 : i32
    %c0_i32_0 = arith.constant 0 : i32
    return %arg0, %c0_i32 : i32, i32
  }
}

</mosaic_0001>

<bundles_post_ra>
// kernel: noisy_dqn_forward.4
= control target key start
LH: loop header
LB: loop body
LE: loop exit
PB: predicated region body
PF: predicated region fallthrough
CT: control target
= control target key end

     0   :  { %vm246_vm0 = vcmask 261120   ;;  %s677_s1 = inlined_call_operand.vmem [shape: f32[256,32], index: 1, kind: input, shape index: {}]   ;;  %s678_s0 = inlined_call_operand.vmem [shape: f32[128,256], index: 0, kind: input, shape index: {}]   ;;  %s679_s2 = inlined_call_operand.vmem [shape: f32[1,32], index: 2, kind: input, shape index: {}]   ;;  %s680_s3 = inlined_call_operand.vmem [shape: f32[128,32], index: 3, kind: output, shape index: {}]  }
   0x1   :  { %v77_v0 = vld [vmem:[%s677_s1 + $0xf8] sm:$0xff]  ;;  %v76_v2 = vld [vmem:[%s677_s1 + $0xf0] sm:$0xff]  ;;  %v75_v4 = vld [vmem:[%s677_s1 + $0xe8] sm:$0xff] }
   0x2   :  { %v61_v1 = vld [vmem:[%s677_s1 + $0x78] sm:$0xff]  ;;  %268 = vmatprep.subr.mxu0 %v77_v0  ;;  %348 = vmatprep.subr.mxu1 %v77_v0  ;;  %v60_v3 = vld [vmem:[%s677_s1 + $0x70] sm:$0xff]  ;;  %v59_v5 = vld [vmem:[%s677_s1 + $0x68] sm:$0xff] }
   0x3   :  { %269 = vmatpush3.msra.mxu0 %v61_v1  ;;  %364 = vmatpush3.msra.mxu1 %v61_v1  ;;  %v74_v6 = vld [vmem:[%s677_s1 + $0xe0] sm:$0xff]  ;;  %v73_v8 = vld [vmem:[%s677_s1 + $0xd8] sm:$0xff]  ;;  %v72_v10 = vld [vmem:[%s677_s1 + $0xd0] sm:$0xff] }
   0x4   :  { %270 = vmatprep.subr.mxu0 %v76_v2  ;;  %349 = vmatprep.subr.mxu1 %v76_v2  ;;  %v58_v7 = vld [vmem:[%s677_s1 + $0x60] sm:$0xff]  ;;  %v57_v9 = vld [vmem:[%s677_s1 + $0x58] sm:$0xff]  ;;  %v56_v11 = vld [vmem:[%s677_s1 + $0x50] sm:$0xff] }
   0x5   :  { %271 = vmatpush3.msra.mxu0 %v60_v3  ;;  %365 = vmatpush3.msra.mxu1 %v60_v3  ;;  %v71_v12 = vld [vmem:[%s677_s1 + $0xc8] sm:$0xff]  ;;  %v70_v14 = vld [vmem:[%s677_s1 + $0xc0] sm:$0xff]  ;;  %v69_v16 = vld [vmem:[%s677_s1 + $0xb8] sm:$0xff] }
   0x6   :  { %272 = vmatprep.subr.mxu0 %v75_v4  ;;  %350 = vmatprep.subr.mxu1 %v75_v4  ;;  %v55_v13 = vld [vmem:[%s677_s1 + $0x48] sm:$0xff]  ;;  %v54_v15 = vld [vmem:[%s677_s1 + $0x40] sm:$0xff]  ;;  %v53_v17 = vld [vmem:[%s677_s1 + $0x38] sm:$0xff] }
   0x7   :  { %273 = vmatpush3.msra.mxu0 %v59_v5  ;;  %366 = vmatpush3.msra.mxu1 %v59_v5  ;;  %v68_v18 = vld [vmem:[%s677_s1 + $0xb0] sm:$0xff]  ;;  %v67_v20 = vld [vmem:[%s677_s1 + $0xa8] sm:$0xff]  ;;  %v66_v22 = vld [vmem:[%s677_s1 + $0xa0] sm:$0xff] }
   0x8   :  { %274 = vmatprep.subr.mxu0 %v74_v6  ;;  %351 = vmatprep.subr.mxu1 %v74_v6  ;;  %v52_v19 = vld [vmem:[%s677_s1 + $0x30] sm:$0xff]  ;;  %v51_v21 = vld [vmem:[%s677_s1 + $0x28] sm:$0xff]  ;;  %v50_v23 = vld [vmem:[%s677_s1 + $0x20] sm:$0xff] }
   0x9   :  { %275 = vmatpush3.msra.mxu0 %v58_v7  ;;  %367 = vmatpush3.msra.mxu1 %v58_v7  ;;  %v65_v24 = vld [vmem:[%s677_s1 + $0x98] sm:$0xff]  ;;  %v64_v26 = vld [vmem:[%s677_s1 + $0x90] sm:$0xff]  ;;  %v63_v28 = vld [vmem:[%s677_s1 + $0x88] sm:$0xff] }
   0xa   :  { %276 = vmatprep.subr.mxu0 %v73_v8  ;;  %352 = vmatprep.subr.mxu1 %v73_v8  ;;  %v49_v25 = vld [vmem:[%s677_s1 + $0x18] sm:$0xff]  ;;  %v48_v27 = vld [vmem:[%s677_s1 + $0x10] sm:$0xff]  ;;  %v47_v29 = vld [vmem:[%s677_s1 + $0x8] sm:$0xff] }
   0xb   :  { %277 = vmatpush3.msra.mxu0 %v57_v9  ;;  %368 = vmatpush3.msra.mxu1 %v57_v9  ;;  %v62_v30 = vld [vmem:[%s677_s1 + $0x80] sm:$0xff]  ;;  %v15_v32 = vld [vmem:[%s678_s0 + $0x8] sm:$0xff]  ;;  %v17_v36 = vld [vmem:[%s678_s0 + $0x18] sm:$0xff] }
   0xc   :  { %278 = vmatprep.subr.mxu0 %v72_v10  ;;  %353 = vmatprep.subr.mxu1 %v72_v10  ;;  %v46_v31 = vld [vmem:[%s677_s1] sm:$0xff]  ;;  %v31_v33 = vld [vmem:[%s678_s0 + $0x88] sm:$0xff]  ;;  %v33_v37 = vld [vmem:[%s678_s0 + $0x98] sm:$0xff] }
   0xd   :  { %279 = vmatpush3.msra.mxu0 %v56_v11  ;;  %369 = vmatpush3.msra.mxu1 %v56_v11  ;;  %v14_v34 = vld [vmem:[%s678_s0] sm:$0xff]  ;;  %v16_v38 = vld [vmem:[%s678_s0 + $0x10] sm:$0xff]  ;;  %v19_v40 = vld [vmem:[%s678_s0 + $0x28] sm:$0xff] }
   0xe   :  { %280 = vmatprep.subr.mxu0 %v71_v12  ;;  %354 = vmatprep.subr.mxu1 %v71_v12  ;;  %v30_v35 = vld [vmem:[%s678_s0 + $0x80] sm:$0xff]  ;;  %v32_v39 = vld [vmem:[%s678_s0 + $0x90] sm:$0xff]  ;;  %v35_v41 = vld [vmem:[%s678_s0 + $0xa8] sm:$0xff] }
   0xf   :  { %281 = vmatpush3.msra.mxu0 %v55_v13  ;;  %370 = vmatpush3.msra.mxu1 %v55_v13  ;;  %v18_v42 = vld [vmem:[%s678_s0 + $0x20] sm:$0xff]  ;;  %v21_v44 = vld [vmem:[%s678_s0 + $0x38] sm:$0xff]  ;;  %v20_v46 = vld [vmem:[%s678_s0 + $0x30] sm:$0xff] }
  0x10   :  { %282 = vmatprep.subr.mxu0 %v70_v14  ;;  %355 = vmatprep.subr.mxu1 %v70_v14  ;;  %v34_v43 = vld [vmem:[%s678_s0 + $0xa0] sm:$0xff]  ;;  %v37_v45 = vld [vmem:[%s678_s0 + $0xb8] sm:$0xff]  ;;  %v36_v47 = vld [vmem:[%s678_s0 + $0xb0] sm:$0xff] }
  0x11   :  { %283 = vmatpush3.msra.mxu0 %v54_v15  ;;  %371 = vmatpush3.msra.mxu1 %v54_v15  ;;  %v23_v48 = vld [vmem:[%s678_s0 + $0x48] sm:$0xff]  ;;  %v22_v50 = vld [vmem:[%s678_s0 + $0x40] sm:$0xff]  ;;  %v25_v52 = vld [vmem:[%s678_s0 + $0x58] sm:$0xff] }
  0x12   :  { %284 = vmatprep.subr.mxu0 %v69_v16  ;;  %356 = vmatprep.subr.mxu1 %v69_v16  ;;  %v39_v49 = vld [vmem:[%s678_s0 + $0xc8] sm:$0xff]  ;;  %v38_v51 = vld [vmem:[%s678_s0 + $0xc0] sm:$0xff]  ;;  %v41_v53 = vld [vmem:[%s678_s0 + $0xd8] sm:$0xff] }
  0x13   :  { %285 = vmatpush3.msra.mxu0 %v53_v17  ;;  %372 = vmatpush3.msra.mxu1 %v53_v17  ;;  %v24_v54 = vld [vmem:[%s678_s0 + $0x50] sm:$0xff]  ;;  %v27_v56 = vld [vmem:[%s678_s0 + $0x68] sm:$0xff]  ;;  %v26_v58 = vld [vmem:[%s678_s0 + $0x60] sm:$0xff] }
  0x14   :  { %286 = vmatprep.subr.mxu0 %v68_v18  ;;  %357 = vmatprep.subr.mxu1 %v68_v18  ;;  %v40_v55 = vld [vmem:[%s678_s0 + $0xd0] sm:$0xff]  ;;  %v43_v57 = vld [vmem:[%s678_s0 + $0xe8] sm:$0xff]  ;;  %v42_v59 = vld [vmem:[%s678_s0 + $0xe0] sm:$0xff] }
  0x15   :  { %287 = vmatpush3.msra.mxu0 %v52_v19  ;;  %373 = vmatpush3.msra.mxu1 %v52_v19  ;;  %v29_v60 = vld [vmem:[%s678_s0 + $0x78] sm:$0xff]  ;;  %v28_v62 = vld [vmem:[%s678_s0 + $0x70] sm:$0xff]  ;;  %v595_v2 = vld [vmem:[%s679_s2] ss:$0 sm:$0xff] }
  0x16   :  { %288 = vmatprep.subr.mxu0 %v67_v20  ;;  %358 = vmatprep.subr.mxu1 %v67_v20  ;;  %v45_v61 = vld [vmem:[%s678_s0 + $0xf8] sm:$0xff]  ;;  %v44_v63 = vld [vmem:[%s678_s0 + $0xf0] sm:$0xff] }
  0x17   :  { %289 = vmatpush3.msra.mxu0 %v51_v21  ;;  %374 = vmatpush3.msra.mxu1 %v51_v21 }
  0x18   :  { %290 = vmatprep.subr.mxu0 %v66_v22  ;;  %359 = vmatprep.subr.mxu1 %v66_v22 }
  0x19   :  { %291 = vmatpush3.msra.mxu0 %v50_v23  ;;  %375 = vmatpush3.msra.mxu1 %v50_v23 }
  0x1a   :  { %292 = vmatprep.subr.mxu0 %v65_v24  ;;  %360 = vmatprep.subr.mxu1 %v65_v24 }
  0x1b   :  { %293 = vmatpush3.msra.mxu0 %v49_v25  ;;  %376 = vmatpush3.msra.mxu1 %v49_v25 }
  0x1c   :  { %294 = vmatprep.subr.mxu0 %v64_v26  ;;  %361 = vmatprep.subr.mxu1 %v64_v26 }
  0x1d   :  { %295 = vmatpush3.msra.mxu0 %v48_v27  ;;  %377 = vmatpush3.msra.mxu1 %v48_v27 }
  0x1e   :  { %296 = vmatprep.subr.mxu0 %v63_v28  ;;  %362 = vmatprep.subr.mxu1 %v63_v28 }
  0x1f   :  { %297 = vmatpush3.msra.mxu0 %v47_v29  ;;  %378 = vmatpush3.msra.mxu1 %v47_v29 }
  0x20   :  { %298 = vmatprep.subr.mxu0 %v62_v30  ;;  %363 = vmatprep.subr.mxu1 %v62_v30 }
  0x21   :  { %299 = vmatpush3.msra.mxu0 %v46_v31  ;;  %379 = vmatpush3.msra.mxu1 %v46_v31 }
  0x22   :  { %149 = vmatprep.mubr.f32.mxu0 %v15_v32  ;;  %189 = vmatprep.mubr.f32.mxu1 %v31_v33 }
  0x23   :  { %150 = vmatmul.mubr.f32.vlgmr.msra.gmra.mxu0 %v14_v34  ;;  %190 = vmatmul.mubr.f32.vlgmr.msra.gmra.mxu1 %v30_v35 }
  0x24   :  { %154 = vmatprep.mubr.f32.mxu0 %v17_v36  ;;  %194 = vmatprep.mubr.f32.mxu1 %v33_v37 }
  0x27   :  { %155 = vmatmul.mubr.f32.gmra.mxu0 %v16_v38  ;;  %195 = vmatmul.mubr.f32.gmra.mxu1 %v32_v39 }
  0x28   :  { %159 = vmatprep.mubr.f32.mxu0 %v19_v40  ;;  %199 = vmatprep.mubr.f32.mxu1 %v35_v41 }
  0x2b   :  { %160 = vmatmul.mubr.f32.gmra.mxu0 %v18_v42  ;;  %200 = vmatmul.mubr.f32.gmra.mxu1 %v34_v43 }
  0x2c   :  { %164 = vmatprep.mubr.f32.mxu0 %v21_v44  ;;  %204 = vmatprep.mubr.f32.mxu1 %v37_v45 }
  0x2f   :  { %165 = vmatmul.mubr.f32.gmra.mxu0 %v20_v46  ;;  %205 = vmatmul.mubr.f32.gmra.mxu1 %v36_v47 }
  0x30   :  { %169 = vmatprep.mubr.f32.mxu0 %v23_v48  ;;  %209 = vmatprep.mubr.f32.mxu1 %v39_v49 }
  0x33   :  { %170 = vmatmul.mubr.f32.gmra.mxu0 %v22_v50  ;;  %210 = vmatmul.mubr.f32.gmra.mxu1 %v38_v51 }
  0x34   :  { %174 = vmatprep.mubr.f32.mxu0 %v25_v52  ;;  %214 = vmatprep.mubr.f32.mxu1 %v41_v53 }
  0x37   :  { %175 = vmatmul.mubr.f32.gmra.mxu0 %v24_v54  ;;  %215 = vmatmul.mubr.f32.gmra.mxu1 %v40_v55 }
  0x38   :  { %179 = vmatprep.mubr.f32.mxu0 %v27_v56  ;;  %219 = vmatprep.mubr.f32.mxu1 %v43_v57 }
  0x3b   :  { %180 = vmatmul.mubr.f32.gmra.mxu0 %v26_v58  ;;  %220 = vmatmul.mubr.f32.gmra.mxu1 %v42_v59 }
  0x3c   :  { %184 = vmatprep.mubr.f32.mxu0 %v29_v60  ;;  %224 = vmatprep.mubr.f32.mxu1 %v45_v61 }
  0x3f   :  { %185 = vmatmul.mubr.f32.gmra.mxu0 %v28_v62  ;;  %225 = vmatmul.mubr.f32.gmra.mxu1 %v44_v63 }
  0xe3   :  { %v300_v0 = vpop.f32.mrf.mxu0  ;;  %v324_v1 = vpop.f32.mrf.mxu1 }
  0xe5   :  { %v301_v3 = vpop.f32.mrf.mxu0  ;;  %v325_v4 = vpop.f32.mrf.mxu1 }
  0xe6   :  { %v302_v5 = vadd.f32 %v301_v3, %v300_v0  ;;  %v326_v6 = vadd.f32 %v325_v4, %v324_v1 }
  0xe7   :  { %v303_v7 = vpop.f32.mrf.mxu0  ;;  %v327_v8 = vpop.f32.mrf.mxu1 }
  0xe8   :  { %v152_v9 = vadd.f32 %v302_v5, %v595_v2  ;;  %v192_v10 = vadd.f32 %v326_v6, %v595_v2 }
  0xe9   :  { %v304_v11 = vpop.f32.mrf.mxu0  ;;  %v328_v12 = vpop.f32.mrf.mxu1 }
  0xea   :  { %v230_v13 = vmax.f32 %v152_v9, 0.0  ;;  %v238_v14 = vmax.f32 %v192_v10, 0.0  ;;  %v305_v15 = vadd.f32 %v304_v11, %v303_v7  ;;  %v329_v16 = vadd.f32 %v328_v12, %v327_v8 }
  0xeb   :  { %v306_v17 = vpop.f32.mrf.mxu0  ;;  %v330_v18 = vpop.f32.mrf.mxu1 }
  0xec   :  { %247 = vst.msk [vmem:[%s680_s3] sm:$0xff] %vm246_vm0, %v230_v13  ;;  %255 = vst.msk [vmem:[%s680_s3 + $0x40] sm:$0xff] %vm246_vm0, %v238_v14  ;;  %v157_v19 = vadd.f32 %v305_v15, %v595_v2  ;;  %v197_v20 = vadd.f32 %v329_v16, %v595_v2 }
  0xed   :  { %v307_v21 = vpop.f32.mrf.mxu0  ;;  %v331_v22 = vpop.f32.mrf.mxu1 }
  0xee   :  { %v231_v23 = vmax.f32 %v157_v19, 0.0  ;;  %v239_v24 = vmax.f32 %v197_v20, 0.0  ;;  %v308_v25 = vadd.f32 %v307_v21, %v306_v17  ;;  %v332_v26 = vadd.f32 %v331_v22, %v330_v18 }
  0xef   :  { %v309_v27 = vpop.f32.mrf.mxu0  ;;  %v333_v28 = vpop.f32.mrf.mxu1 }
  0xf0   :  { %248 = vst.msk [vmem:[%s680_s3 + $0x8] sm:$0xff] %vm246_vm0, %v231_v23  ;;  %256 = vst.msk [vmem:[%s680_s3 + $0x48] sm:$0xff] %vm246_vm0, %v239_v24  ;;  %v162_v29 = vadd.f32 %v308_v25, %v595_v2  ;;  %v202_v30 = vadd.f32 %v332_v26, %v595_v2 }
  0xf1   :  { %v310_v31 = vpop.f32.mrf.mxu0  ;;  %v334_v32 = vpop.f32.mrf.mxu1 }
  0xf2   :  { %v232_v33 = vmax.f32 %v162_v29, 0.0  ;;  %v240_v34 = vmax.f32 %v202_v30, 0.0  ;;  %v311_v35 = vadd.f32 %v310_v31, %v309_v27  ;;  %v335_v36 = vadd.f32 %v334_v32, %v333_v28 }
  0xf3   :  { %v312_v37 = vpop.f32.mrf.mxu0  ;;  %v336_v38 = vpop.f32.mrf.mxu1 }
  0xf4   :  { %249 = vst.msk [vmem:[%s680_s3 + $0x10] sm:$0xff] %vm246_vm0, %v232_v33  ;;  %257 = vst.msk [vmem:[%s680_s3 + $0x50] sm:$0xff] %vm246_vm0, %v240_v34  ;;  %v167_v39 = vadd.f32 %v311_v35, %v595_v2  ;;  %v207_v40 = vadd.f32 %v335_v36, %v595_v2 }
  0xf5   :  { %v313_v41 = vpop.f32.mrf.mxu0  ;;  %v337_v42 = vpop.f32.mrf.mxu1 }
  0xf6   :  { %v233_v43 = vmax.f32 %v167_v39, 0.0  ;;  %v241_v44 = vmax.f32 %v207_v40, 0.0  ;;  %v314_v45 = vadd.f32 %v313_v41, %v312_v37  ;;  %v338_v46 = vadd.f32 %v337_v42, %v336_v38 }
  0xf7   :  { %v315_v47 = vpop.f32.mrf.mxu0  ;;  %v339_v48 = vpop.f32.mrf.mxu1 }
  0xf8   :  { %250 = vst.msk [vmem:[%s680_s3 + $0x18] sm:$0xff] %vm246_vm0, %v233_v43  ;;  %258 = vst.msk [vmem:[%s680_s3 + $0x58] sm:$0xff] %vm246_vm0, %v241_v44  ;;  %v172_v49 = vadd.f32 %v314_v45, %v595_v2  ;;  %v212_v50 = vadd.f32 %v338_v46, %v595_v2 }
  0xf9   :  { %v316_v51 = vpop.f32.mrf.mxu0  ;;  %v340_v52 = vpop.f32.mrf.mxu1 }
  0xfa   :  { %v234_v53 = vmax.f32 %v172_v49, 0.0  ;;  %v242_v54 = vmax.f32 %v212_v50, 0.0  ;;  %v317_v55 = vadd.f32 %v316_v51, %v315_v47  ;;  %v341_v56 = vadd.f32 %v340_v52, %v339_v48 }
  0xfb   :  { %v318_v57 = vpop.f32.mrf.mxu0  ;;  %v342_v58 = vpop.f32.mrf.mxu1 }
  0xfc   :  { %251 = vst.msk [vmem:[%s680_s3 + $0x20] sm:$0xff] %vm246_vm0, %v234_v53  ;;  %259 = vst.msk [vmem:[%s680_s3 + $0x60] sm:$0xff] %vm246_vm0, %v242_v54  ;;  %v177_v59 = vadd.f32 %v317_v55, %v595_v2  ;;  %v217_v60 = vadd.f32 %v341_v56, %v595_v2 }
  0xfd   :  { %v319_v61 = vpop.f32.mrf.mxu0  ;;  %v343_v62 = vpop.f32.mrf.mxu1 }
  0xfe   :  { %v235_v63 = vmax.f32 %v177_v59, 0.0  ;;  %v243_v0 = vmax.f32 %v217_v60, 0.0  ;;  %v320_v1 = vadd.f32 %v319_v61, %v318_v57  ;;  %v344_v3 = vadd.f32 %v343_v62, %v342_v58 }
  0xff   :  { %v321_v4 = vpop.f32.mrf.mxu0  ;;  %v345_v5 = vpop.f32.mrf.mxu1 }
 0x100   :  { %252 = vst.msk [vmem:[%s680_s3 + $0x28] sm:$0xff] %vm246_vm0, %v235_v63  ;;  %260 = vst.msk [vmem:[%s680_s3 + $0x68] sm:$0xff] %vm246_vm0, %v243_v0  ;;  %v182_v6 = vadd.f32 %v320_v1, %v595_v2  ;;  %v222_v7 = vadd.f32 %v344_v3, %v595_v2 }
 0x101   :  { %v322_v8 = vpop.f32.mrf.mxu0  ;;  %v346_v9 = vpop.f32.mrf.mxu1 }
 0x102   :  { %v236_v10 = vmax.f32 %v182_v6, 0.0  ;;  %v244_v11 = vmax.f32 %v222_v7, 0.0  ;;  %v323_v12 = vadd.f32 %v322_v8, %v321_v4  ;;  %v347_v13 = vadd.f32 %v346_v9, %v345_v5 }
 0x104   :  { %253 = vst.msk [vmem:[%s680_s3 + $0x30] sm:$0xff] %vm246_vm0, %v236_v10  ;;  %261 = vst.msk [vmem:[%s680_s3 + $0x70] sm:$0xff] %vm246_vm0, %v244_v11  ;;  %v187_v14 = vadd.f32 %v323_v12, %v595_v2  ;;  %v227_v15 = vadd.f32 %v347_v13, %v595_v2 }
 0x106   :  { %v237_v16 = vmax.f32 %v187_v14, 0.0  ;;  %v245_v17 = vmax.f32 %v227_v15, 0.0 }
 0x108   :  { %254 = vst.msk [vmem:[%s680_s3 + $0x38] sm:$0xff] %vm246_vm0, %v237_v16  ;;  %262 = vst.msk [vmem:[%s680_s3 + $0x78] sm:$0xff] %vm246_vm0, %v245_v17 }

// kernel: noisy_dqn_forward.5
= control target key start
LH: loop header
LB: loop body
LE: loop exit
PB: predicated region body
PF: predicated region fallthrough
CT: control target
= control target key end

     0   :  { %vm260_vm0 = vcmask 523264   ;;  %s614_s1 = inlined_call_operand.vmem [shape: f32[512,64], index: 1, kind: input, shape index: {}]   ;;  %s615_s0 = inlined_call_operand.vmem [shape: f32[24,512], index: 0, kind: input, shape index: {}]   ;;  %s616_s2 = inlined_call_operand.vmem [shape: f32[1,64], index: 2, kind: input, shape index: {}]   ;;  %s617_s3 = inlined_call_operand.vmem [shape: f32[24,64], index: 3, kind: output, shape index: {}]  }
   0x1   :  { %v57_v0 = vld [vmem:[%s614_s1 + $0xf8] sm:$0xff]  ;;  %v56_v4 = vld [vmem:[%s614_s1 + $0xf0] sm:$0xff]  ;;  %v55_v8 = vld [vmem:[%s614_s1 + $0xe8] sm:$0xff] }
   0x2   :  { %v89_v1 = vld [vmem:[%s614_s1 + $0x1f8] sm:$0xff]  ;;  %269 = vmatprep.subr.mxu0 %v57_v0  ;;  %v88_v5 = vld [vmem:[%s614_s1 + $0x1f0] sm:$0xff]  ;;  %v87_v9 = vld [vmem:[%s614_s1 + $0x1e8] sm:$0xff] }
   0x3   :  { %v41_v2 = vld [vmem:[%s614_s1 + $0x78] sm:$0xff]  ;;  %310 = vmatprep.subr.mxu1 %v89_v1  ;;  %v40_v6 = vld [vmem:[%s614_s1 + $0x70] sm:$0xff]  ;;  %v39_v10 = vld [vmem:[%s614_s1 + $0x68] sm:$0xff] }
   0x4   :  { %v73_v3 = vld [vmem:[%s614_s1 + $0x178] sm:$0xff]  ;;  %270 = vmatpush3.msra.mxu0 %v41_v2  ;;  %v72_v7 = vld [vmem:[%s614_s1 + $0x170] sm:$0xff]  ;;  %v71_v11 = vld [vmem:[%s614_s1 + $0x168] sm:$0xff] }
   0x5   :  { %311 = vmatpush3.msra.mxu1 %v73_v3  ;;  %271 = vmatprep.subr.mxu0 %v56_v4  ;;  %v54_v12 = vld [vmem:[%s614_s1 + $0xe0] sm:$0xff]  ;;  %v53_v16 = vld [vmem:[%s614_s1 + $0xd8] sm:$0xff]  ;;  %v52_v20 = vld [vmem:[%s614_s1 + $0xd0] sm:$0xff] }
   0x6   :  { %312 = vmatprep.subr.mxu1 %v88_v5  ;;  %272 = vmatpush3.msra.mxu0 %v40_v6  ;;  %v86_v13 = vld [vmem:[%s614_s1 + $0x1e0] sm:$0xff]  ;;  %v85_v17 = vld [vmem:[%s614_s1 + $0x1d8] sm:$0xff]  ;;  %v84_v21 = vld [vmem:[%s614_s1 + $0x1d0] sm:$0xff] }
   0x7   :  { %313 = vmatpush3.msra.mxu1 %v72_v7  ;;  %273 = vmatprep.subr.mxu0 %v55_v8  ;;  %v38_v14 = vld [vmem:[%s614_s1 + $0x60] sm:$0xff]  ;;  %v37_v18 = vld [vmem:[%s614_s1 + $0x58] sm:$0xff]  ;;  %v36_v22 = vld [vmem:[%s614_s1 + $0x50] sm:$0xff] }
   0x8   :  { %314 = vmatprep.subr.mxu1 %v87_v9  ;;  %v70_v15 = vld [vmem:[%s614_s1 + $0x160] sm:$0xff]  ;;  %274 = vmatpush3.msra.mxu0 %v39_v10  ;;  %v69_v19 = vld [vmem:[%s614_s1 + $0x158] sm:$0xff]  ;;  %v68_v23 = vld [vmem:[%s614_s1 + $0x150] sm:$0xff] }
   0x9   :  { %315 = vmatpush3.msra.mxu1 %v71_v11  ;;  %275 = vmatprep.subr.mxu0 %v54_v12  ;;  %v51_v24 = vld [vmem:[%s614_s1 + $0xc8] sm:$0xff]  ;;  %v50_v28 = vld [vmem:[%s614_s1 + $0xc0] sm:$0xff]  ;;  %v49_v32 = vld [vmem:[%s614_s1 + $0xb8] sm:$0xff] }
   0xa   :  { %316 = vmatprep.subr.mxu1 %v86_v13  ;;  %276 = vmatpush3.msra.mxu0 %v38_v14  ;;  %v83_v25 = vld [vmem:[%s614_s1 + $0x1c8] sm:$0xff]  ;;  %v82_v29 = vld [vmem:[%s614_s1 + $0x1c0] sm:$0xff]  ;;  %v81_v33 = vld [vmem:[%s614_s1 + $0x1b8] sm:$0xff] }
   0xb   :  { %317 = vmatpush3.msra.mxu1 %v70_v15  ;;  %277 = vmatprep.subr.mxu0 %v53_v16  ;;  %v35_v26 = vld [vmem:[%s614_s1 + $0x48] sm:$0xff]  ;;  %v34_v30 = vld [vmem:[%s614_s1 + $0x40] sm:$0xff]  ;;  %v33_v34 = vld [vmem:[%s614_s1 + $0x38] sm:$0xff] }
   0xc   :  { %318 = vmatprep.subr.mxu1 %v85_v17  ;;  %278 = vmatpush3.msra.mxu0 %v37_v18  ;;  %v67_v27 = vld [vmem:[%s614_s1 + $0x148] sm:$0xff]  ;;  %v66_v31 = vld [vmem:[%s614_s1 + $0x140] sm:$0xff]  ;;  %v65_v35 = vld [vmem:[%s614_s1 + $0x138] sm:$0xff] }
   0xd   :  { %319 = vmatpush3.msra.mxu1 %v69_v19  ;;  %279 = vmatprep.subr.mxu0 %v52_v20  ;;  %v48_v36 = vld [vmem:[%s614_s1 + $0xb0] sm:$0xff]  ;;  %v47_v40 = vld [vmem:[%s614_s1 + $0xa8] sm:$0xff]  ;;  %v46_v44 = vld [vmem:[%s614_s1 + $0xa0] sm:$0xff] }
   0xe   :  { %320 = vmatprep.subr.mxu1 %v84_v21  ;;  %280 = vmatpush3.msra.mxu0 %v36_v22  ;;  %v80_v37 = vld [vmem:[%s614_s1 + $0x1b0] sm:$0xff]  ;;  %v79_v41 = vld [vmem:[%s614_s1 + $0x1a8] sm:$0xff]  ;;  %v78_v45 = vld [vmem:[%s614_s1 + $0x1a0] sm:$0xff] }
   0xf   :  { %321 = vmatpush3.msra.mxu1 %v68_v23  ;;  %281 = vmatprep.subr.mxu0 %v51_v24  ;;  %v32_v38 = vld [vmem:[%s614_s1 + $0x30] sm:$0xff]  ;;  %v31_v42 = vld [vmem:[%s614_s1 + $0x28] sm:$0xff]  ;;  %v30_v46 = vld [vmem:[%s614_s1 + $0x20] sm:$0xff] }
  0x10   :  { %322 = vmatprep.subr.mxu1 %v83_v25  ;;  %282 = vmatpush3.msra.mxu0 %v35_v26  ;;  %v64_v39 = vld [vmem:[%s614_s1 + $0x130] sm:$0xff]  ;;  %v63_v43 = vld [vmem:[%s614_s1 + $0x128] sm:$0xff]  ;;  %v62_v47 = vld [vmem:[%s614_s1 + $0x120] sm:$0xff] }
  0x11   :  { %323 = vmatpush3.msra.mxu1 %v67_v27  ;;  %283 = vmatprep.subr.mxu0 %v50_v28  ;;  %v45_v48 = vld [vmem:[%s614_s1 + $0x98] sm:$0xff]  ;;  %v44_v52 = vld [vmem:[%s614_s1 + $0x90] sm:$0xff]  ;;  %v43_v56 = vld [vmem:[%s614_s1 + $0x88] sm:$0xff] }
  0x12   :  { %324 = vmatprep.subr.mxu1 %v82_v29  ;;  %284 = vmatpush3.msra.mxu0 %v34_v30  ;;  %v77_v49 = vld [vmem:[%s614_s1 + $0x198] sm:$0xff]  ;;  %v76_v53 = vld [vmem:[%s614_s1 + $0x190] sm:$0xff]  ;;  %v75_v57 = vld [vmem:[%s614_s1 + $0x188] sm:$0xff] }
  0x13   :  { %325 = vmatpush3.msra.mxu1 %v66_v31  ;;  %285 = vmatprep.subr.mxu0 %v49_v32  ;;  %v29_v50 = vld [vmem:[%s614_s1 + $0x18] sm:$0xff]  ;;  %v28_v54 = vld [vmem:[%s614_s1 + $0x10] sm:$0xff]  ;;  %v27_v58 = vld [vmem:[%s614_s1 + $0x8] sm:$0xff] }
  0x14   :  { %326 = vmatprep.subr.mxu1 %v81_v33  ;;  %286 = vmatpush3.msra.mxu0 %v33_v34  ;;  %v61_v51 = vld [vmem:[%s614_s1 + $0x118] sm:$0xff]  ;;  %v60_v55 = vld [vmem:[%s614_s1 + $0x110] sm:$0xff]  ;;  %v59_v59 = vld [vmem:[%s614_s1 + $0x108] sm:$0xff] }
  0x15   :  { %327 = vmatpush3.msra.mxu1 %v65_v35  ;;  %287 = vmatprep.subr.mxu0 %v48_v36  ;;  %v42_v60 = vld [vmem:[%s614_s1 + $0x80] sm:$0xff]  ;;  %v15_v63 = vld [vmem:[%s615_s0 + $0x8] sm:$0xff]  ;;  %v17_v1 = vld [vmem:[%s615_s0 + $0x18] sm:$0xff] }
  0x16   :  { %328 = vmatprep.subr.mxu1 %v80_v37  ;;  %288 = vmatpush3.msra.mxu0 %v32_v38  ;;  %v74_v61 = vld [vmem:[%s614_s1 + $0x180] sm:$0xff]  ;;  %v16_v3 = vld [vmem:[%s615_s0 + $0x10] sm:$0xff]  ;;  %v19_v4 = vld [vmem:[%s615_s0 + $0x28] sm:$0xff] }
  0x17   :  { %329 = vmatpush3.msra.mxu1 %v64_v39  ;;  %289 = vmatprep.subr.mxu0 %v47_v40  ;;  %v26_v62 = vld [vmem:[%s614_s1] sm:$0xff]  ;;  %v21_v5 = vld [vmem:[%s615_s0 + $0x38] sm:$0xff]  ;;  %v20_v7 = vld [vmem:[%s615_s0 + $0x30] sm:$0xff] }
  0x18   :  { %330 = vmatprep.subr.mxu1 %v79_v41  ;;  %290 = vmatpush3.msra.mxu0 %v31_v42  ;;  %v58_v0 = vld [vmem:[%s614_s1 + $0x100] sm:$0xff]  ;;  %v23_v8 = vld [vmem:[%s615_s0 + $0x48] sm:$0xff]  ;;  %v25_v9 = vld [vmem:[%s615_s0 + $0x58] sm:$0xff] }
  0x19   :  { %331 = vmatpush3.msra.mxu1 %v63_v43  ;;  %291 = vmatprep.subr.mxu0 %v46_v44  ;;  %v14_v2 = vld [vmem:[%s615_s0] sm:$0xff]  ;;  %v24_v11 = vld [vmem:[%s615_s0 + $0x50] sm:$0xff] }
  0x1a   :  { %332 = vmatprep.subr.mxu1 %v78_v45  ;;  %292 = vmatpush3.msra.mxu0 %v30_v46  ;;  %v18_v6 = vld [vmem:[%s615_s0 + $0x20] sm:$0xff] }
  0x1b   :  { %333 = vmatpush3.msra.mxu1 %v62_v47  ;;  %293 = vmatprep.subr.mxu0 %v45_v48  ;;  %v22_v10 = vld [vmem:[%s615_s0 + $0x40] sm:$0xff] }
  0x1c   :  { %334 = vmatprep.subr.mxu1 %v77_v49  ;;  %294 = vmatpush3.msra.mxu0 %v29_v50  ;;  %v268_v14 = vld [vmem:[%s616_s2] ss:$0 sm:$0xff] }
  0x1d   :  { %335 = vmatpush3.msra.mxu1 %v61_v51  ;;  %295 = vmatprep.subr.mxu0 %v44_v52 }
  0x1e   :  { %336 = vmatprep.subr.mxu1 %v76_v53  ;;  %296 = vmatpush3.msra.mxu0 %v28_v54 }
  0x1f   :  { %337 = vmatpush3.msra.mxu1 %v60_v55  ;;  %297 = vmatprep.subr.mxu0 %v43_v56 }
  0x20   :  { %338 = vmatprep.subr.mxu1 %v75_v57  ;;  %298 = vmatpush3.msra.mxu0 %v27_v58 }
  0x21   :  { %339 = vmatpush3.msra.mxu1 %v59_v59  ;;  %299 = vmatprep.subr.mxu0 %v42_v60 }
  0x22   :  { %340 = vmatprep.subr.mxu1 %v74_v61  ;;  %300 = vmatpush3.msra.mxu0 %v26_v62 }
  0x23   :  { %161 = vmatprep.mubr.f32.mxu0 %v15_v63  ;;  %341 = vmatpush3.msra.mxu1 %v58_v0 }
  0x24   :  { %241 = vmatprep.mubr.f32.mxu1 %v17_v1  ;;  %162 = vmatmul.mubr.f32.vlgmr.msra.gmra.mxu0 %v14_v2 }
  0x25   :  { %242 = vmatmul.mubr.f32.vlgmr.msra.gmra.mxu1 %v16_v3  ;;  %166 = vmatprep.mubr.f32.mxu0 %v19_v4 }
  0x26   :  { %246 = vmatprep.mubr.f32.mxu1 %v21_v5 }
  0x28   :  { %167 = vmatmul.mubr.f32.gmra.mxu0 %v18_v6 }
  0x29   :  { %247 = vmatmul.mubr.f32.gmra.mxu1 %v20_v7  ;;  %171 = vmatprep.mubr.f32.mxu0 %v23_v8 }
  0x2a   :  { %251 = vmatprep.mubr.f32.mxu1 %v25_v9 }
  0x2c   :  { %172 = vmatmul.mubr.f32.gmra.mxu0 %v22_v10 }
  0x2d   :  { %252 = vmatmul.mubr.f32.gmra.mxu1 %v24_v11 }
  0xe4   :  { %v301_v12 = vpop.f32.mrf.mxu0 }
  0xe5   :  { %v342_v13 = vpop.f32.mrf.mxu1 }
  0xe6   :  { %v302_v15 = vpop.f32.mrf.mxu0 }
  0xe7   :  { %v343_v16 = vpop.f32.mrf.mxu1  ;;  %v303_v17 = vadd.f32 %v302_v15, %v301_v12 }
  0xe8   :  { %v304_v18 = vpop.f32.mrf.mxu0  ;;  %v344_v21 = vadd.f32 %v343_v16, %v342_v13 }
  0xe9   :  { %v345_v19 = vpop.f32.mrf.mxu1  ;;  %v164_v20 = vadd.f32 %v303_v17, %v268_v14 }
  0xea   :  { %v305_v22 = vpop.f32.mrf.mxu0 }
  0xeb   :  { %v346_v23 = vpop.f32.mrf.mxu1  ;;  %v244_v24 = vadd.f32 %v344_v21, %v164_v20  ;;  %v306_v25 = vadd.f32 %v305_v22, %v304_v18 }
  0xec   :  { %v307_v26 = vpop.f32.mrf.mxu0  ;;  %v347_v30 = vadd.f32 %v346_v23, %v345_v19 }
  0xed   :  { %v348_v27 = vpop.f32.mrf.mxu1  ;;  %v257_v28 = vmax.f32 %v244_v24, 0.0  ;;  %v169_v29 = vadd.f32 %v306_v25, %v268_v14 }
  0xee   :  { %v308_v31 = vpop.f32.mrf.mxu0 }
  0xef   :  { %v349_v32 = vpop.f32.mrf.mxu1  ;;  %261 = vst.msk [vmem:[%s617_s3] sm:$0xff] %vm260_vm0, %v257_v28  ;;  %v249_v33 = vadd.f32 %v347_v30, %v169_v29  ;;  %v309_v34 = vadd.f32 %v308_v31, %v307_v26 }
  0xf0   :  { %v350_v37 = vadd.f32 %v349_v32, %v348_v27 }
  0xf1   :  { %v258_v35 = vmax.f32 %v249_v33, 0.0  ;;  %v174_v36 = vadd.f32 %v309_v34, %v268_v14 }
  0xf3   :  { %262 = vst.msk [vmem:[%s617_s3 + $0x8] sm:$0xff] %vm260_vm0, %v258_v35  ;;  %v254_v38 = vadd.f32 %v350_v37, %v174_v36 }
  0xf5   :  { %v259_v39 = vmax.f32 %v254_v38, 0.0 }
  0xf7   :  { %263 = vst.msk [vmem:[%s617_s3 + $0x10] sm:$0xff] %vm260_vm0, %v259_v39 }

// kernel: noisy_dqn_forward.6
= control target key start
LH: loop header
LB: loop body
LE: loop exit
PB: predicated region body
PF: predicated region fallthrough
CT: control target
= control target key end

     0   :  { %vm420_vm0 = vmmov 0   ;;  %vm98_vm1 = vcmask 523264   ;;  %s680_s1 = inlined_call_operand.vmem [shape: f32[576,64], index: 1, kind: input, shape index: {}]   ;;  %s681_s0 = inlined_call_operand.vmem [shape: f32[8,576], index: 0, kind: input, shape index: {}]   ;;  %s682_s2 = inlined_call_operand.vmem [shape: f32[1,64], index: 2, kind: input, shape index: {}]   ;;  %s683_s3 = inlined_call_operand.vmem [shape: f32[8,64], index: 3, kind: output, shape index: {}]  }
   0x1   :  { %v50_v0 = vld [vmem:[%s680_s1 + $0xf8] sm:$0xff]  ;;  %v49_v2 = vld [vmem:[%s680_s1 + $0xf0] sm:$0xff]  ;;  %v48_v6 = vld [vmem:[%s680_s1 + $0xe8] sm:$0xff] }
   0x2   :  { %v34_v1 = vld [vmem:[%s680_s1 + $0x78] sm:$0xff]  ;;  %319 = vmatprep.subr.mxu0 %v50_v0  ;;  %v33_v4 = vld [vmem:[%s680_s1 + $0x70] sm:$0xff]  ;;  %v32_v8 = vld [vmem:[%s680_s1 + $0x68] sm:$0xff] }
   0x3   :  { %v82_v3 = vld [vmem:[%s680_s1 + $0x1f8] sm:$0xff]  ;;  %320 = vmatpush3.msra.mxu0 %v34_v1  ;;  %v81_v7 = vld [vmem:[%s680_s1 + $0x1f0] sm:$0xff]  ;;  %v80_v10 = vld [vmem:[%s680_s1 + $0x1e8] sm:$0xff] }
   0x4   :  { %v66_v5 = vld [vmem:[%s680_s1 + $0x178] sm:$0xff]  ;;  %354 = vmatprep.subr.mxu1 %v82_v3  ;;  %321 = vmatprep.subr.mxu0 %v49_v2  ;;  %v65_v9 = vld [vmem:[%s680_s1 + $0x170] sm:$0xff]  ;;  %v47_v11 = vld [vmem:[%s680_s1 + $0xe0] sm:$0xff] }
   0x5   :  { %355 = vmatpush3.msra.mxu1 %v66_v5  ;;  %322 = vmatpush3.msra.mxu0 %v33_v4  ;;  %v64_v12 = vld [vmem:[%s680_s1 + $0x168] sm:$0xff]  ;;  %v31_v13 = vld [vmem:[%s680_s1 + $0x60] sm:$0xff]  ;;  %v46_v15 = vld [vmem:[%s680_s1 + $0xd8] sm:$0xff]  ;;  %v419_v5 = vmov 0.0  }
   0x6   :  { %356 = vmatprep.subr.mxu1 %v81_v7  ;;  %323 = vmatprep.subr.mxu0 %v48_v6  ;;  %v79_v14 = vld [vmem:[%s680_s1 + $0x1e0] sm:$0xff]  ;;  %v30_v17 = vld [vmem:[%s680_s1 + $0x58] sm:$0xff]  ;;  %v45_v19 = vld [vmem:[%s680_s1 + $0xd0] sm:$0xff] }
   0x7   :  { %357 = vmatpush3.msra.mxu1 %v65_v9  ;;  %324 = vmatpush3.msra.mxu0 %v32_v8  ;;  %v63_v16 = vld [vmem:[%s680_s1 + $0x160] sm:$0xff]  ;;  %v78_v18 = vld [vmem:[%s680_s1 + $0x1d8] sm:$0xff]  ;;  %v29_v21 = vld [vmem:[%s680_s1 + $0x50] sm:$0xff] }
   0x8   :  { %358 = vmatprep.subr.mxu1 %v80_v10  ;;  %325 = vmatprep.subr.mxu0 %v47_v11  ;;  %v62_v20 = vld [vmem:[%s680_s1 + $0x158] sm:$0xff]  ;;  %v77_v22 = vld [vmem:[%s680_s1 + $0x1d0] sm:$0xff]  ;;  %v44_v23 = vld [vmem:[%s680_s1 + $0xc8] sm:$0xff] }
   0x9   :  { %359 = vmatpush3.msra.mxu1 %v64_v12  ;;  %326 = vmatpush3.msra.mxu0 %v31_v13  ;;  %v61_v24 = vld [vmem:[%s680_s1 + $0x150] sm:$0xff]  ;;  %v28_v25 = vld [vmem:[%s680_s1 + $0x48] sm:$0xff]  ;;  %v43_v27 = vld [vmem:[%s680_s1 + $0xc0] sm:$0xff] }
   0xa   :  { %360 = vmatprep.subr.mxu1 %v79_v14  ;;  %327 = vmatprep.subr.mxu0 %v46_v15  ;;  %v76_v26 = vld [vmem:[%s680_s1 + $0x1c8] sm:$0xff]  ;;  %v27_v29 = vld [vmem:[%s680_s1 + $0x40] sm:$0xff]  ;;  %v42_v31 = vld [vmem:[%s680_s1 + $0xb8] sm:$0xff] }
   0xb   :  { %361 = vmatpush3.msra.mxu1 %v63_v16  ;;  %328 = vmatpush3.msra.mxu0 %v30_v17  ;;  %v60_v28 = vld [vmem:[%s680_s1 + $0x148] sm:$0xff]  ;;  %v75_v30 = vld [vmem:[%s680_s1 + $0x1c0] sm:$0xff]  ;;  %v26_v33 = vld [vmem:[%s680_s1 + $0x38] sm:$0xff] }
   0xc   :  { %362 = vmatprep.subr.mxu1 %v78_v18  ;;  %329 = vmatprep.subr.mxu0 %v45_v19  ;;  %v59_v32 = vld [vmem:[%s680_s1 + $0x140] sm:$0xff]  ;;  %v74_v34 = vld [vmem:[%s680_s1 + $0x1b8] sm:$0xff]  ;;  %v41_v35 = vld [vmem:[%s680_s1 + $0xb0] sm:$0xff] }
   0xd   :  { %363 = vmatpush3.msra.mxu1 %v62_v20  ;;  %330 = vmatpush3.msra.mxu0 %v29_v21  ;;  %v58_v36 = vld [vmem:[%s680_s1 + $0x138] sm:$0xff]  ;;  %v25_v37 = vld [vmem:[%s680_s1 + $0x30] sm:$0xff]  ;;  %v40_v39 = vld [vmem:[%s680_s1 + $0xa8] sm:$0xff] }
   0xe   :  { %364 = vmatprep.subr.mxu1 %v77_v22  ;;  %331 = vmatprep.subr.mxu0 %v44_v23  ;;  %v73_v38 = vld [vmem:[%s680_s1 + $0x1b0] sm:$0xff]  ;;  %v24_v41 = vld [vmem:[%s680_s1 + $0x28] sm:$0xff]  ;;  %v39_v43 = vld [vmem:[%s680_s1 + $0xa0] sm:$0xff] }
   0xf   :  { %365 = vmatpush3.msra.mxu1 %v61_v24  ;;  %332 = vmatpush3.msra.mxu0 %v28_v25  ;;  %v57_v40 = vld [vmem:[%s680_s1 + $0x130] sm:$0xff]  ;;  %v72_v42 = vld [vmem:[%s680_s1 + $0x1a8] sm:$0xff]  ;;  %v23_v45 = vld [vmem:[%s680_s1 + $0x20] sm:$0xff] }
  0x10   :  { %366 = vmatprep.subr.mxu1 %v76_v26  ;;  %333 = vmatprep.subr.mxu0 %v43_v27  ;;  %v56_v44 = vld [vmem:[%s680_s1 + $0x128] sm:$0xff]  ;;  %v71_v46 = vld [vmem:[%s680_s1 + $0x1a0] sm:$0xff]  ;;  %v38_v47 = vld [vmem:[%s680_s1 + $0x98] sm:$0xff] }
  0x11   :  { %367 = vmatpush3.msra.mxu1 %v60_v28  ;;  %334 = vmatpush3.msra.mxu0 %v27_v29  ;;  %v55_v48 = vld [vmem:[%s680_s1 + $0x120] sm:$0xff]  ;;  %v22_v49 = vld [vmem:[%s680_s1 + $0x18] sm:$0xff]  ;;  %v37_v51 = vld [vmem:[%s680_s1 + $0x90] sm:$0xff] }
  0x12   :  { %368 = vmatprep.subr.mxu1 %v75_v30  ;;  %335 = vmatprep.subr.mxu0 %v42_v31  ;;  %v70_v50 = vld [vmem:[%s680_s1 + $0x198] sm:$0xff]  ;;  %v21_v53 = vld [vmem:[%s680_s1 + $0x10] sm:$0xff]  ;;  %v36_v55 = vld [vmem:[%s680_s1 + $0x88] sm:$0xff] }
  0x13   :  { %369 = vmatpush3.msra.mxu1 %v59_v32  ;;  %336 = vmatpush3.msra.mxu0 %v26_v33  ;;  %v54_v52 = vld [vmem:[%s680_s1 + $0x118] sm:$0xff]  ;;  %v69_v54 = vld [vmem:[%s680_s1 + $0x190] sm:$0xff]  ;;  %v20_v57 = vld [vmem:[%s680_s1 + $0x8] sm:$0xff] }
  0x14   :  { %370 = vmatprep.subr.mxu1 %v74_v34  ;;  %337 = vmatprep.subr.mxu0 %v41_v35  ;;  %v53_v56 = vld [vmem:[%s680_s1 + $0x110] sm:$0xff]  ;;  %v68_v58 = vld [vmem:[%s680_s1 + $0x188] sm:$0xff]  ;;  %v35_v59 = vld [vmem:[%s680_s1 + $0x80] sm:$0xff] }
  0x15   :  { %371 = vmatpush3.msra.mxu1 %v58_v36  ;;  %338 = vmatpush3.msra.mxu0 %v25_v37  ;;  %v15_v60 = vld [vmem:[%s681_s0 + $0x8] sm:$0xff]  ;;  %v19_v61 = vld [vmem:[%s680_s1] sm:$0xff]  ;;  %v17_v2 = vld [vmem:[%s681_s0 + $0x18] sm:$0xff] }
  0x16   :  { %372 = vmatprep.subr.mxu1 %v73_v38  ;;  %339 = vmatprep.subr.mxu0 %v40_v39  ;;  %v52_v62 = vld [vmem:[%s680_s1 + $0x108] sm:$0xff]  ;;  %v14_v63 = vld [vmem:[%s681_s0] sm:$0xff]  ;;  %v90_v3 = vld [vmem:[%s680_s1 + $0x238] sm:$0xff] }
  0x17   :  { %373 = vmatpush3.msra.mxu1 %v57_v40  ;;  %340 = vmatpush3.msra.mxu0 %v24_v41  ;;  %v67_v0 = vld [vmem:[%s680_s1 + $0x180] sm:$0xff]  ;;  %v16_v4 = vld [vmem:[%s681_s0 + $0x10] sm:$0xff]  ;;  %v88_v7 = vld [vmem:[%s680_s1 + $0x228] sm:$0xff] }
  0x18   :  { %374 = vmatprep.subr.mxu1 %v72_v42  ;;  %341 = vmatprep.subr.mxu0 %v39_v43  ;;  %v51_v1 = vld [vmem:[%s680_s1 + $0x100] sm:$0xff]  ;;  %v89_v6 = vld [vmem:[%s680_s1 + $0x230] sm:$0xff]  ;;  %v86_v9 = vld [vmem:[%s680_s1 + $0x218] sm:$0xff] }
  0x19   :  { %375 = vmatpush3.msra.mxu1 %v56_v44  ;;  %342 = vmatpush3.msra.mxu0 %v23_v45  ;;  %v87_v8 = vld [vmem:[%s680_s1 + $0x220] sm:$0xff]  ;;  %v85_v10 = vld [vmem:[%s680_s1 + $0x210] sm:$0xff]  ;;  %v84_v11 = vld [vmem:[%s680_s1 + $0x208] sm:$0xff] }
  0x1a   :  { %376 = vmatprep.subr.mxu1 %v71_v46  ;;  %343 = vmatprep.subr.mxu0 %v38_v47  ;;  %v83_v12 = vld [vmem:[%s680_s1 + $0x200] sm:$0xff] }
  0x1b   :  { %377 = vmatpush3.msra.mxu1 %v55_v48  ;;  %344 = vmatpush3.msra.mxu0 %v22_v49  ;;  %v18_v13 = vld [vmem:[%s681_s0 + $0x20] sm:$0xff] }
  0x1c   :  { %378 = vmatprep.subr.mxu1 %v70_v50  ;;  %345 = vmatprep.subr.mxu0 %v37_v51  ;;  %v317_v18 = vld [vmem:[%s682_s2] ss:$0 sm:$0xff] }
  0x1d   :  { %379 = vmatpush3.msra.mxu1 %v54_v52  ;;  %346 = vmatpush3.msra.mxu0 %v21_v53 }
  0x1e   :  { %380 = vmatprep.subr.mxu1 %v69_v54  ;;  %347 = vmatprep.subr.mxu0 %v36_v55 }
  0x1f   :  { %381 = vmatpush3.msra.mxu1 %v53_v56  ;;  %348 = vmatpush3.msra.mxu0 %v20_v57 }
  0x20   :  { %382 = vmatprep.subr.mxu1 %v68_v58  ;;  %349 = vmatprep.subr.mxu0 %v35_v59 }
  0x21   :  { %166 = vmatprep.mubr.f32.mxu0 %v15_v60  ;;  %350 = vmatpush3.msra.mxu0 %v19_v61 }
  0x22   :  { %383 = vmatpush3.msra.mxu1 %v52_v62  ;;  %167 = vmatmul.mubr.f32.vlgmr.msra.gmra.mxu0 %v14_v63 }
  0x23   :  { %384 = vmatprep.subr.mxu1 %v67_v0  ;;  %398 = vmatprep.subr.mxu0 %v419_v5 }
  0x24   :  { %385 = vmatpush3.msra.mxu1 %v51_v1  ;;  %236 = vmatprep.mubr.f32.mxu1 %v17_v2 }
  0x25   :  { %399 = vmatpush3.msra.mxu0 %v90_v3  ;;  %237 = vmatmul.mubr.f32.vlgmr.msra.gmra.mxu1 %v16_v4 }
  0x26   :  { %400 = vmatprep.subr.mxu0 %v419_v5  ;;  %414 = vmatprep.mubr.msk.f32.mxu0 %vm420_vm0, %v419_v5 }
  0x27   :  { %401 = vmatpush3.msra.mxu0 %v89_v6 }
  0x28   :  { %402 = vmatprep.subr.mxu0 %v419_v5 }
  0x29   :  { %403 = vmatpush3.msra.mxu0 %v88_v7 }
  0x2a   :  { %404 = vmatprep.subr.mxu0 %v419_v5 }
  0x2b   :  { %405 = vmatpush3.msra.mxu0 %v87_v8 }
  0x2c   :  { %406 = vmatprep.subr.mxu0 %v419_v5 }
  0x2d   :  { %407 = vmatpush3.msra.mxu0 %v86_v9 }
  0x2e   :  { %408 = vmatprep.subr.mxu0 %v419_v5 }
  0x2f   :  { %409 = vmatpush3.msra.mxu0 %v85_v10 }
  0x30   :  { %410 = vmatprep.subr.mxu0 %v419_v5 }
  0x31   :  { %411 = vmatpush3.msra.mxu0 %v84_v11 }
  0x32   :  { %412 = vmatprep.subr.mxu0 %v419_v5 }
  0x33   :  { %413 = vmatpush3.msra.mxu0 %v83_v12 }
  0x34   :  { %415 = vmatmul.mubr.msk.f32.vlgmr.msra.gmra.mxu0 %vm98_vm1, %v18_v13 }
  0xe2   :  { %v351_v14 = vpop.f32.mrf.mxu0 }
  0xe4   :  { %v352_v15 = vpop.f32.mrf.mxu0 }
  0xe5   :  { %v386_v16 = vpop.f32.mrf.mxu1  ;;  %v353_v17 = vadd.f32 %v352_v15, %v351_v14 }
  0xe7   :  { %v387_v19 = vpop.f32.mrf.mxu1  ;;  %v169_v20 = vadd.f32 %v353_v17, %v317_v18 }
  0xe8   :  { %v388_v21 = vadd.f32 %v387_v19, %v386_v16 }
  0xea   :  { %v239_v22 = vadd.f32 %v388_v21, %v169_v20 }
  0xf4   :  { %v308_v23 = vpop.f32.mrf.mxu0 }
  0xf5   :  { %v309_v24 = vadd.f32 %v308_v23, %v239_v22 }
  0xf6   :  { %v416_v25 = vpop.f32.mrf.mxu0 }
  0xf7   :  { %312 = vst.msk [vmem:[%s683_s3] sm:$0xff] %vm98_vm1, %v309_v24 }

// kernel: noisy_dqn_forward.7
= control target key start
LH: loop header
LB: loop body
LE: loop exit
PB: predicated region body
PF: predicated region fallthrough
CT: control target
= control target key end

     0   :  { %v515_v3 = vmov 0.0   ;;  %vm75_vm0 = vcmask 523264   ;;  %s846_s1 = inlined_call_operand.vmem [shape: f32[64,512], index: 1, kind: input, shape index: {}]   ;;  %s847_s0 = inlined_call_operand.vmem [shape: f32[8,64], index: 0, kind: input, shape index: {}]   ;;  %s848_s3 = inlined_call_operand.vmem [shape: f32[512,128], index: 3, kind: input, shape index: {}]   ;;  %s849_s2 = inlined_call_operand.vmem [shape: f32[1,512], index: 2, kind: input, shape index: {}]   ;;  %s850_s4 = inlined_call_operand.vmem [shape: f32[1,128], index: 4, kind: input, shape index: {}]   ;;  %s851_s5 = inlined_call_operand.vmem [shape: f32[8,128], index: 5, kind: output, shape index: {}]  }
   0x1   :  { %v50_v0 = vld [vmem:[%s846_s1 + $0xe8] sm:$0xff]  ;;  %v52_v1 = vld [vmem:[%s846_s1 + $0xf8] sm:$0xff]  ;;  %v49_v2 = vld [vmem:[%s846_s1 + $0xe0] sm:$0xff]  ;;  %143 = vmatprep.mubr.f32.mxu0 %v515_v3  ;;  %214 = vmatprep.mubr.f32.mxu1 %v515_v3 }
   0x2   :  { %95 = vmatprep.subr.mxu0 %v50_v0  ;;  %166 = vmatprep.subr.mxu1 %v52_v1  ;;  %v51_v4 = vld [vmem:[%s846_s1 + $0xf0] sm:$0xff]  ;;  %v46_v5 = vld [vmem:[%s846_s1 + $0xc8] sm:$0xff]  ;;  %v48_v6 = vld [vmem:[%s846_s1 + $0xd8] sm:$0xff] }
   0x3   :  { %96 = vmatpush1.msra.mxu0 %v49_v2  ;;  %167 = vmatpush1.msra.mxu1 %v51_v4  ;;  %v45_v7 = vld [vmem:[%s846_s1 + $0xc0] sm:$0xff]  ;;  %v47_v8 = vld [vmem:[%s846_s1 + $0xd0] sm:$0xff]  ;;  %v42_v9 = vld [vmem:[%s846_s1 + $0xa8] sm:$0xff] }
   0x4   :  { %97 = vmatprep.subr.mxu0 %v46_v5  ;;  %168 = vmatprep.subr.mxu1 %v48_v6  ;;  %v44_v10 = vld [vmem:[%s846_s1 + $0xb8] sm:$0xff]  ;;  %v41_v11 = vld [vmem:[%s846_s1 + $0xa0] sm:$0xff]  ;;  %v43_v12 = vld [vmem:[%s846_s1 + $0xb0] sm:$0xff] }
   0x5   :  { %98 = vmatpush1.msra.mxu0 %v45_v7  ;;  %169 = vmatpush1.msra.mxu1 %v47_v8  ;;  %v38_v13 = vld [vmem:[%s846_s1 + $0x88] sm:$0xff]  ;;  %v40_v14 = vld [vmem:[%s846_s1 + $0x98] sm:$0xff]  ;;  %v37_v15 = vld [vmem:[%s846_s1 + $0x80] sm:$0xff] }
   0x6   :  { %99 = vmatprep.subr.mxu0 %v42_v9  ;;  %170 = vmatprep.subr.mxu1 %v44_v10  ;;  %v39_v16 = vld [vmem:[%s846_s1 + $0x90] sm:$0xff]  ;;  %v34_v17 = vld [vmem:[%s846_s1 + $0x68] sm:$0xff]  ;;  %v36_v18 = vld [vmem:[%s846_s1 + $0x78] sm:$0xff] }
   0x7   :  { %100 = vmatpush1.msra.mxu0 %v41_v11  ;;  %171 = vmatpush1.msra.mxu1 %v43_v12  ;;  %v33_v19 = vld [vmem:[%s846_s1 + $0x60] sm:$0xff]  ;;  %v35_v20 = vld [vmem:[%s846_s1 + $0x70] sm:$0xff]  ;;  %v30_v21 = vld [vmem:[%s846_s1 + $0x48] sm:$0xff] }
   0x8   :  { %101 = vmatprep.subr.mxu0 %v38_v13  ;;  %172 = vmatprep.subr.mxu1 %v40_v14  ;;  %v32_v22 = vld [vmem:[%s846_s1 + $0x58] sm:$0xff]  ;;  %v29_v23 = vld [vmem:[%s846_s1 + $0x40] sm:$0xff]  ;;  %v31_v24 = vld [vmem:[%s846_s1 + $0x50] sm:$0xff] }
   0x9   :  { %102 = vmatpush1.msra.mxu0 %v37_v15  ;;  %173 = vmatpush1.msra.mxu1 %v39_v16  ;;  %v26_v25 = vld [vmem:[%s846_s1 + $0x28] sm:$0xff]  ;;  %v28_v26 = vld [vmem:[%s846_s1 + $0x38] sm:$0xff]  ;;  %v25_v27 = vld [vmem:[%s846_s1 + $0x20] sm:$0xff] }
   0xa   :  { %103 = vmatprep.subr.mxu0 %v34_v17  ;;  %174 = vmatprep.subr.mxu1 %v36_v18  ;;  %v27_v28 = vld [vmem:[%s846_s1 + $0x30] sm:$0xff]  ;;  %v22_v29 = vld [vmem:[%s846_s1 + $0x8] sm:$0xff]  ;;  %v24_v30 = vld [vmem:[%s846_s1 + $0x18] sm:$0xff] }
   0xb   :  { %104 = vmatpush1.msra.mxu0 %v33_v19  ;;  %175 = vmatpush1.msra.mxu1 %v35_v20  ;;  %v21_v31 = vld [vmem:[%s846_s1] sm:$0xff]  ;;  %v23_v32 = vld [vmem:[%s846_s1 + $0x10] sm:$0xff]  ;;  %v256_v34 = vld [vmem:[%s848_s3 + $0xf8] sm:$0xff] }
   0xc   :  { %105 = vmatprep.subr.mxu0 %v30_v21  ;;  %176 = vmatprep.subr.mxu1 %v32_v22  ;;  %v20_v33 = vld [vmem:[%s847_s0] sm:$0xff]  ;;  %v288_v35 = vld [vmem:[%s848_s3 + $0x1f8] sm:$0xff]  ;;  %v255_v38 = vld [vmem:[%s848_s3 + $0xf0] sm:$0xff] }
   0xd   :  { %106 = vmatpush1.msra.mxu0 %v29_v23  ;;  %177 = vmatpush1.msra.mxu1 %v31_v24  ;;  %v240_v36 = vld [vmem:[%s848_s3 + $0x78] sm:$0xff]  ;;  %v287_v39 = vld [vmem:[%s848_s3 + $0x1f0] sm:$0xff]  ;;  %v254_v42 = vld [vmem:[%s848_s3 + $0xe8] sm:$0xff] }
   0xe   :  { %107 = vmatprep.subr.mxu0 %v26_v25  ;;  %178 = vmatprep.subr.mxu1 %v28_v26  ;;  %v272_v37 = vld [vmem:[%s848_s3 + $0x178] sm:$0xff]  ;;  %v239_v40 = vld [vmem:[%s848_s3 + $0x70] sm:$0xff]  ;;  %v286_v43 = vld [vmem:[%s848_s3 + $0x1e8] sm:$0xff] }
   0xf   :  { %108 = vmatpush1.msra.mxu0 %v25_v27  ;;  %179 = vmatpush1.msra.mxu1 %v27_v28  ;;  %v271_v41 = vld [vmem:[%s848_s3 + $0x170] sm:$0xff]  ;;  %v238_v44 = vld [vmem:[%s848_s3 + $0x68] sm:$0xff]  ;;  %v253_v46 = vld [vmem:[%s848_s3 + $0xe0] sm:$0xff] }
  0x10   :  { %109 = vmatprep.subr.mxu0 %v22_v29  ;;  %180 = vmatprep.subr.mxu1 %v24_v30  ;;  %v270_v45 = vld [vmem:[%s848_s3 + $0x168] sm:$0xff]  ;;  %v285_v47 = vld [vmem:[%s848_s3 + $0x1e0] sm:$0xff]  ;;  %v252_v50 = vld [vmem:[%s848_s3 + $0xd8] sm:$0xff] }
  0x11   :  { %110 = vmatpush1.msra.mxu0 %v21_v31  ;;  %181 = vmatpush1.msra.mxu1 %v23_v32  ;;  %v237_v48 = vld [vmem:[%s848_s3 + $0x60] sm:$0xff]  ;;  %v284_v51 = vld [vmem:[%s848_s3 + $0x1d8] sm:$0xff]  ;;  %v251_v54 = vld [vmem:[%s848_s3 + $0xd0] sm:$0xff] }
  0x12   :  { %441 = vmatmul.mubr.msk.f32.vlgmr.msra.gmra.mxu0 %vm75_vm0, %v20_v33  ;;  %442 = vmatmul.mubr.msk.f32.vlgmr.msra.gmra.mxu1 %vm75_vm0, %v20_v33  ;;  %v269_v49 = vld [vmem:[%s848_s3 + $0x160] sm:$0xff]  ;;  %v236_v52 = vld [vmem:[%s848_s3 + $0x58] sm:$0xff]  ;;  %v283_v55 = vld [vmem:[%s848_s3 + $0x1d0] sm:$0xff] }
  0x13   :  { %444 = vmatprep.subr.mxu0 %v256_v34  ;;  %479 = vmatprep.subr.mxu1 %v288_v35  ;;  %v268_v53 = vld [vmem:[%s848_s3 + $0x158] sm:$0xff]  ;;  %v235_v56 = vld [vmem:[%s848_s3 + $0x50] sm:$0xff]  ;;  %v250_v58 = vld [vmem:[%s848_s3 + $0xc8] sm:$0xff]  ;;  %v55_v34 = vlaneseq }
  0x14   :  { %445 = vmatpush3.msra.mxu0 %v240_v36  ;;  %480 = vmatpush3.msra.mxu1 %v272_v37  ;;  %v267_v57 = vld [vmem:[%s848_s3 + $0x150] sm:$0xff]  ;;  %v282_v59 = vld [vmem:[%s848_s3 + $0x1c8] sm:$0xff]  ;;  %v249_v62 = vld [vmem:[%s848_s3 + $0xc0] sm:$0xff] }
  0x15   :  { %446 = vmatprep.subr.mxu0 %v255_v38  ;;  %481 = vmatprep.subr.mxu1 %v287_v39  ;;  %v234_v60 = vld [vmem:[%s848_s3 + $0x48] sm:$0xff]  ;;  %v281_v63 = vld [vmem:[%s848_s3 + $0x1c0] sm:$0xff]  ;;  %v248_v2 = vld [vmem:[%s848_s3 + $0xb8] sm:$0xff]  ;;  %v56_v35 = vshrl.u32 %v55_v34, 7 }
  0x16   :  { %447 = vmatpush3.msra.mxu0 %v239_v40  ;;  %482 = vmatpush3.msra.mxu1 %v271_v41  ;;  %v266_v61 = vld [vmem:[%s848_s3 + $0x148] sm:$0xff]  ;;  %v233_v0 = vld [vmem:[%s848_s3 + $0x40] sm:$0xff]  ;;  %v280_v3 = vld [vmem:[%s848_s3 + $0x1b8] sm:$0xff] }
  0x17   :  { %448 = vmatprep.subr.mxu0 %v254_v42  ;;  %483 = vmatprep.subr.mxu1 %v286_v43  ;;  %v265_v1 = vld [vmem:[%s848_s3 + $0x140] sm:$0xff]  ;;  %v232_v4 = vld [vmem:[%s848_s3 + $0x38] sm:$0xff]  ;;  %v247_v6 = vld [vmem:[%s848_s3 + $0xb0] sm:$0xff]  ;;  %v65_v36 = vsub.s32 2, %v56_v35  ;;  %v57_v37 = vsub.s32 0, %v56_v35  ;;  %v61_v39 = vsub.s32 1, %v56_v35 }
  0x18   :  { %449 = vmatpush3.msra.mxu0 %v238_v44  ;;  %484 = vmatpush3.msra.mxu1 %v270_v45  ;;  %v264_v5 = vld [vmem:[%s848_s3 + $0x138] sm:$0xff]  ;;  %v279_v7 = vld [vmem:[%s848_s3 + $0x1b0] sm:$0xff]  ;;  %v246_v10 = vld [vmem:[%s848_s3 + $0xa8] sm:$0xff]  ;;  %v69_v40 = vsub.s32 3, %v56_v35 }
  0x19   :  { %450 = vmatprep.subr.mxu0 %v253_v46  ;;  %485 = vmatprep.subr.mxu1 %v285_v47  ;;  %v231_v8 = vld [vmem:[%s848_s3 + $0x30] sm:$0xff]  ;;  %v278_v11 = vld [vmem:[%s848_s3 + $0x1a8] sm:$0xff]  ;;  %v245_v14 = vld [vmem:[%s848_s3 + $0xa0] sm:$0xff] }
  0x1a   :  { %451 = vmatpush3.msra.mxu0 %v237_v48  ;;  %486 = vmatpush3.msra.mxu1 %v269_v49  ;;  %v263_v9 = vld [vmem:[%s848_s3 + $0x130] sm:$0xff]  ;;  %v230_v12 = vld [vmem:[%s848_s3 + $0x28] sm:$0xff]  ;;  %v277_v15 = vld [vmem:[%s848_s3 + $0x1a0] sm:$0xff] }
  0x1b   :  { %452 = vmatprep.subr.mxu0 %v252_v50  ;;  %487 = vmatprep.subr.mxu1 %v284_v51  ;;  %v262_v13 = vld [vmem:[%s848_s3 + $0x128] sm:$0xff]  ;;  %v229_v16 = vld [vmem:[%s848_s3 + $0x20] sm:$0xff]  ;;  %v244_v18 = vld [vmem:[%s848_s3 + $0x98] sm:$0xff] }
  0x1c   :  { %453 = vmatpush3.msra.mxu0 %v236_v52  ;;  %488 = vmatpush3.msra.mxu1 %v268_v53  ;;  %v261_v17 = vld [vmem:[%s848_s3 + $0x120] sm:$0xff]  ;;  %v276_v19 = vld [vmem:[%s848_s3 + $0x198] sm:$0xff]  ;;  %v243_v22 = vld [vmem:[%s848_s3 + $0x90] sm:$0xff] }
  0x1d   :  { %454 = vmatprep.subr.mxu0 %v251_v54  ;;  %489 = vmatprep.subr.mxu1 %v283_v55  ;;  %v228_v20 = vld [vmem:[%s848_s3 + $0x18] sm:$0xff]  ;;  %v275_v23 = vld [vmem:[%s848_s3 + $0x190] sm:$0xff]  ;;  %v242_v26 = vld [vmem:[%s848_s3 + $0x88] sm:$0xff] }
  0x1e   :  { %455 = vmatpush3.msra.mxu0 %v235_v56  ;;  %490 = vmatpush3.msra.mxu1 %v267_v57  ;;  %v260_v21 = vld [vmem:[%s848_s3 + $0x118] sm:$0xff]  ;;  %v227_v24 = vld [vmem:[%s848_s3 + $0x10] sm:$0xff]  ;;  %v274_v27 = vld [vmem:[%s848_s3 + $0x188] sm:$0xff] }
  0x1f   :  { %456 = vmatprep.subr.mxu0 %v250_v58  ;;  %491 = vmatprep.subr.mxu1 %v282_v59  ;;  %v259_v25 = vld [vmem:[%s848_s3 + $0x110] sm:$0xff]  ;;  %v226_v28 = vld [vmem:[%s848_s3 + $0x8] sm:$0xff]  ;;  %v241_v30 = vld [vmem:[%s848_s3 + $0x80] sm:$0xff] }
  0x20   :  { %457 = vmatpush3.msra.mxu0 %v234_v60  ;;  %492 = vmatpush3.msra.mxu1 %v266_v61  ;;  %v258_v29 = vld [vmem:[%s848_s3 + $0x108] sm:$0xff]  ;;  %v273_v31 = vld [vmem:[%s848_s3 + $0x180] sm:$0xff] }
  0x21   :  { %458 = vmatprep.subr.mxu0 %v249_v62  ;;  %493 = vmatprep.subr.mxu1 %v281_v63  ;;  %v225_v32 = vld [vmem:[%s848_s3] sm:$0xff] }
  0x22   :  { %459 = vmatpush3.msra.mxu0 %v233_v0  ;;  %494 = vmatpush3.msra.mxu1 %v265_v1  ;;  %v257_v33 = vld [vmem:[%s848_s3 + $0x100] sm:$0xff] }
  0x23   :  { %460 = vmatprep.subr.mxu0 %v248_v2  ;;  %495 = vmatprep.subr.mxu1 %v280_v3  ;;  %v53_v38 = vld [vmem:[%s849_s2] sm:$0xf] }
  0x24   :  { %461 = vmatpush3.msra.mxu0 %v232_v4  ;;  %496 = vmatpush3.msra.mxu1 %v264_v5  ;;  %v66_v41 = vrot.slane %v53_v38, %v65_v36  ;;  %v58_v42 = vrot.slane %v53_v38, %v57_v37  ;;  %v62_v43 = vrot.slane %v53_v38, %v61_v39  ;;  %v443_v59 = vld [vmem:[%s850_s4] ss:$0 sm:$0xff] }
  0x25   :  { %462 = vmatprep.subr.mxu0 %v247_v6  ;;  %497 = vmatprep.subr.mxu1 %v279_v7  ;;  %v70_v44 = vrot.slane %v53_v38, %v69_v40 }
  0x26   :  { %463 = vmatpush3.msra.mxu0 %v231_v8  ;;  %498 = vmatpush3.msra.mxu1 %v263_v9 }
  0x27   :  { %464 = vmatprep.subr.mxu0 %v246_v10  ;;  %499 = vmatprep.subr.mxu1 %v278_v11 }
  0x28   :  { %465 = vmatpush3.msra.mxu0 %v230_v12  ;;  %500 = vmatpush3.msra.mxu1 %v262_v13 }
  0x29   :  { %466 = vmatprep.subr.mxu0 %v245_v14  ;;  %501 = vmatprep.subr.mxu1 %v277_v15 }
  0x2a   :  { %467 = vmatpush3.msra.mxu0 %v229_v16  ;;  %502 = vmatpush3.msra.mxu1 %v261_v17 }
  0x2b   :  { %468 = vmatprep.subr.mxu0 %v244_v18  ;;  %503 = vmatprep.subr.mxu1 %v276_v19 }
  0x2c   :  { %469 = vmatpush3.msra.mxu0 %v228_v20  ;;  %504 = vmatpush3.msra.mxu1 %v260_v21 }
  0x2d   :  { %470 = vmatprep.subr.mxu0 %v243_v22  ;;  %505 = vmatprep.subr.mxu1 %v275_v23 }
  0x2e   :  { %471 = vmatpush3.msra.mxu0 %v227_v24  ;;  %506 = vmatpush3.msra.mxu1 %v259_v25 }
  0x2f   :  { %472 = vmatprep.subr.mxu0 %v242_v26  ;;  %507 = vmatprep.subr.mxu1 %v274_v27 }
  0x30   :  { %473 = vmatpush3.msra.mxu0 %v226_v28  ;;  %508 = vmatpush3.msra.mxu1 %v258_v29 }
  0x31   :  { %474 = vmatprep.subr.mxu0 %v241_v30  ;;  %509 = vmatprep.subr.mxu1 %v273_v31 }
  0x32   :  { %475 = vmatpush3.msra.mxu0 %v225_v32  ;;  %510 = vmatpush3.msra.mxu1 %v257_v33 }
  0xd2   :  { %v145_v45 = vpop.f32.mrf.mxu0  ;;  %v216_v46 = vpop.f32.mrf.mxu1 }
  0xd3   :  { %v217_v47 = vadd.f32 %v216_v46, %v66_v41  ;;  %v146_v48 = vadd.f32 %v145_v45, %v58_v42 }
  0xd4   :  { %v147_v49 = vpop.f32.mrf.mxu0  ;;  %v218_v50 = vpop.f32.mrf.mxu1 }
  0xd5   :  { %v148_v51 = vadd.f32 %v147_v49, %v62_v43  ;;  %v219_v52 = vadd.f32 %v218_v50, %v70_v44  ;;  %v223_v53 = vmax.f32 %v217_v47, 0.0  ;;  %v221_v56 = vmax.f32 %v146_v48, 0.0 }
  0xd7   :  { %v222_v54 = vmax.f32 %v148_v51, 0.0  ;;  %v224_v55 = vmax.f32 %v219_v52, 0.0 }
  0xd9   :  { %360 = vmatprep.mubr.f32.mxu0 %v222_v54  ;;  %430 = vmatprep.mubr.f32.mxu1 %v224_v55 }
  0xda   :  { %361 = vmatmul.mubr.f32.vlgmr.msra.gmra.mxu0 %v221_v56  ;;  %431 = vmatmul.mubr.f32.vlgmr.msra.gmra.mxu1 %v223_v53 }
 0x19a   :  { %v476_v57 = vpop.f32.mrf.mxu0  ;;  %v511_v58 = vpop.f32.mrf.mxu1 }
 0x19c   :  { %v477_v60 = vpop.f32.mrf.mxu0  ;;  %v512_v61 = vpop.f32.mrf.mxu1 }
 0x19d   :  { %v478_v62 = vadd.f32 %v477_v60, %v476_v57  ;;  %v513_v0 = vadd.f32 %v512_v61, %v511_v58 }
 0x19f   :  { %v363_v63 = vadd.f32 %v478_v62, %v443_v59 }
 0x1a1   :  { %v433_v1 = vadd.f32 %v513_v0, %v363_v63 }
 0x1a3   :  { %436 = vst [vmem:[%s851_s5] sm:$0xff] %v433_v1 }

</bundles_post_ra>
